<compile_context>
chip_gen: v5e
topology: v5e:2x2
jax: 0.10.0
libtpu: 0.0.40
codegen_flags: <defaults>
</compile_context>

<pallas_src>
import jax
import jax.numpy as jnp
from jax.experimental import pallas as pl
from jax.experimental.pallas import tpu as pltpu

IN_DIM = 28 * 28      # 784  (784 = 98*8, so the weight sublane dim is aligned)
H1 = 512
H2 = 512
OUT_DIM = 10
N_PAD = 128           # round_up(10, 128) -> lane-dense output


def _round_up(n, m):
    return ((n + m - 1) // m) * m


def make_mlp_kernel(n_splits):
    """Fused 3-layer MLP kernel over one (TB, 784) batch tile.

    n_splits=2 statically unrolls two half-row sub-tiles so the VPU epilogue
    (bias + ReLU + bf16 cast) of one half overlaps the MXU matmuls of the
    other half.  n_splits=1 for small tiles.
    """
    def mlp_kernel(x_ref, w1_ref, b1_ref, w2_ref, b2_ref, w3_ref, b3_ref, o_ref):
        tb = x_ref.shape[0]
        rows = tb // n_splits
        # Hoist the (VMEM-resident) weight/bias loads out of the unrolled loop.
        w1 = w1_ref[...]
        b1 = b1_ref[...]
        w2 = w2_ref[...]
        b2 = b2_ref[...]
        w3 = w3_ref[...]
        b3 = b3_ref[...]
        for s in range(n_splits):
            lo = s * rows                                   # static -> free ref view
            x = x_ref[lo:lo + rows, :].astype(jnp.bfloat16)  # in-kernel f32->bf16 cast
            h1 = jnp.dot(x, w1, preferred_element_type=jnp.float32) + b1
            h1 = jnp.maximum(h1, 0.0).astype(jnp.bfloat16)   # (rows, 512)
            h2 = jnp.dot(h1, w2, preferred_element_type=jnp.float32) + b2
            h2 = jnp.maximum(h2, 0.0).astype(jnp.bfloat16)   # (rows, 512)
            h3 = jnp.dot(h2, w3, preferred_element_type=jnp.float32) + b3
            o_ref[lo:lo + rows, :] = jnp.maximum(h3, 0.0).astype(o_ref.dtype)
    return mlp_kernel


def prepare_params(params):
    """One-time prep: weights stored as (in, out), cast to bf16; last layer
    zero-padded 10 -> 128 output columns (sliced away in the wrapper, so the
    result is unchanged); biases kept f32 as (1, N) rows."""
    w1, b1, w2, b2, w3, b3 = params
    w1p = w1.astype(jnp.bfloat16)                                   # (784, 512)
    w2p = w2.astype(jnp.bfloat16)                                   # (512, 512)
    w3p = (jnp.zeros((H2, N_PAD), jnp.float32)
           .at[:, :OUT_DIM].set(w3).astype(jnp.bfloat16))           # (512, 128)
    b1p = b1.reshape(1, H1).astype(jnp.float32)
    b2p = b2.reshape(1, H2).astype(jnp.float32)
    b3p = jnp.zeros((1, N_PAD), jnp.float32).at[0, :OUT_DIM].set(b3)
    return (w1p, b1p, w2p, b2p, w3p, b3p)


def neural_network_forward(x, prepared_params):
    """x: (B, 28, 28) or (B, 1, 28, 28) float32.  Returns logits (B, 10) f32."""
    w1, b1, w2, b2, w3, b3 = prepared_params
    B = x.shape[0]
    x_flat = x.reshape(B, IN_DIM)       # nn.Flatten: metadata-only reshape

    # ---- batch tiling policy ----
    # B < 256: single grid step with a full-batch block (no padding at all;
    #          the full-array-dim exception allows a (B, 784) block).
    # B >= 256: at least 2 grid steps (both v7x TensorCores get work), tile
    #           capped at 512 rows, rounded to 16 so the in-kernel half-tiles
    #           stay 8-sublane aligned.  Padding is at most 15 rows.
    if B < 256:
        TB = B
        B_pad = B
    else:
        n_steps = max(2, -(-B // 512))
        TB = _round_up(-(-B // n_steps), 16)
        B_pad = n_steps * TB

    if B_pad != B:
        x_flat = jnp.pad(x_flat, ((0, B_pad - B), (0, 0)))

    grid = (B_pad // TB,)
    n_splits = 2 if (TB >= 128 and TB % 16 == 0) else 1

    # VMEM budget at TB=512 (worst case): x f32 tile 1.6 MB x2 buffers, out
    # 0.26 MB x2, bf16 weights ~1.45 MB x2 -> ~7 MiB, well under the 32 MiB
    # scoped default on every generation, so no vmem_limit_bytes override.
    out = pl.pallas_call(
        make_mlp_kernel(n_splits),
        out_shape=jax.ShapeDtypeStruct((B_pad, N_PAD), jnp.float32),
        grid_spec=pltpu.PrefetchScalarGridSpec(
            num_scalar_prefetch=0,
            grid=grid,
            in_specs=[
                # Activations: tiled over the batch grid axis, K kept at 784
                # (full-array-dim block; Mosaic pads lanes internally).
                pl.BlockSpec((TB, IN_DIM), lambda i: (i, 0)),
                # Weights / biases: constant index_map -> VMEM-resident,
                # never re-DMA'd across grid steps.
                pl.BlockSpec((IN_DIM, H1), lambda i: (0, 0)),
                pl.BlockSpec((1, H1), lambda i: (0, 0)),
                pl.BlockSpec((H1, H2), lambda i: (0, 0)),
                pl.BlockSpec((1, H2), lambda i: (0, 0)),
                pl.BlockSpec((H2, N_PAD), lambda i: (0, 0)),
                pl.BlockSpec((1, N_PAD), lambda i: (0, 0)),
            ],
            out_specs=pl.BlockSpec((TB, N_PAD), lambda i: (i, 0)),
        ),
        compiler_params=pltpu.CompilerParams(
            dimension_semantics=("parallel",)),
    )(x_flat, w1, b1, w2, b2, w3, b3)

    # Drop batch padding and the 118 padded output lanes.
    return out[:B, :OUT_DIM]


def init_params(key):
    """Deterministic init mirroring nn.Linear default: U(-1/sqrt(fan_in), +).
    Weights stored transposed as (in_features, out_features)."""
    dims = [(IN_DIM, H1), (H1, H2), (H2, OUT_DIM)]
    params = []
    for i, (fan_in, fan_out) in enumerate(dims):
        kw, kb = jax.random.split(jax.random.fold_in(key, i))
        bound = 1.0 / jnp.sqrt(jnp.float32(fan_in))
        w = jax.random.uniform(kw, (fan_in, fan_out), jnp.float32, -bound, bound)
        b = jax.random.uniform(kb, (fan_out,), jnp.float32, -bound, bound)
        params += [w, b]
    return tuple(params)


if __name__ == "__main__":
    key = jax.random.PRNGKey(0)
    k_x, k_p = jax.random.split(key)

    B = 2
    x = jax.random.normal(k_x, (B, 28, 28), jnp.float32)
    params = init_params(k_p)
    prepared = prepare_params(params)

    logits = neural_network_forward(x, prepared)
    jax.block_until_ready(logits)

    # Pure-JAX f32 reference of the same forward pass.  Tolerance accounts for
    # bf16 matmul operands (f32 accumulation) in the kernel.
    w1, b1, w2, b2, w3, b3 = params
    xf = x.reshape(B, -1)
    ref = jnp.maximum(xf @ w1 + b1[None, :], 0.0)
    ref = jnp.maximum(ref @ w2 + b2[None, :], 0.0)
    ref = jnp.maximum(ref @ w3 + b3[None, :], 0.0)

    assert logits.shape == (B, 10)
    assert jnp.allclose(logits, ref, atol=3e-2, rtol=3e-2), (
        f"max abs err = {jnp.max(jnp.abs(logits - ref))}")

    print("KERNEL_OK")
</pallas_src>

<mosaic_0001>
module attributes {stable_mosaic.version = 11 : i64} {
  func.func @mlp_kernel(%arg0: i32, %arg1: memref<2x784xf32, #tpu.memory_space<vmem>>, %arg2: memref<784x512xbf16, #tpu.memory_space<vmem>>, %arg3: memref<1x512xf32, #tpu.memory_space<vmem>>, %arg4: memref<512x512xbf16, #tpu.memory_space<vmem>>, %arg5: memref<1x512xf32, #tpu.memory_space<vmem>>, %arg6: memref<512x128xbf16, #tpu.memory_space<vmem>>, %arg7: memref<1x128xf32, #tpu.memory_space<vmem>>, %arg8: memref<2x128xf32, #tpu.memory_space<vmem>>) attributes {dimension_semantics = [#tpu.dimension_semantics<parallel>], iteration_bounds = array<i64: 1>, scalar_prefetch = 0 : i64, scratch_operands = 0 : i64, tpu.core_type = #tpu.core_type<tc>, window_params = [{transform_indices = @transform_0, window_bounds = array<i64: 2, 784>}, {pipeline_mode = #tpu.pipeline_mode<synchronous>, transform_indices = @transform_1, window_bounds = array<i64: 784, 512>}, {pipeline_mode = #tpu.pipeline_mode<synchronous>, transform_indices = @transform_2, window_bounds = array<i64: 1, 512>}, {pipeline_mode = #tpu.pipeline_mode<synchronous>, transform_indices = @transform_3, window_bounds = array<i64: 512, 512>}, {pipeline_mode = #tpu.pipeline_mode<synchronous>, transform_indices = @transform_4, window_bounds = array<i64: 1, 512>}, {pipeline_mode = #tpu.pipeline_mode<synchronous>, transform_indices = @transform_5, window_bounds = array<i64: 512, 128>}, {pipeline_mode = #tpu.pipeline_mode<synchronous>, transform_indices = @transform_6, window_bounds = array<i64: 1, 128>}, {transform_indices = @transform_7, window_bounds = array<i64: 2, 128>}]} {
    %c0 = arith.constant 0 : index
    %c0_0 = arith.constant 0 : index
    %0 = vector.load %arg2[%c0, %c0_0] : memref<784x512xbf16, #tpu.memory_space<vmem>>, vector<784x512xbf16>
    %c0_1 = arith.constant 0 : index
    %c0_2 = arith.constant 0 : index
    %1 = vector.load %arg3[%c0_1, %c0_2] : memref<1x512xf32, #tpu.memory_space<vmem>>, vector<1x512xf32>
    %c0_3 = arith.constant 0 : index
    %c0_4 = arith.constant 0 : index
    %2 = vector.load %arg4[%c0_3, %c0_4] : memref<512x512xbf16, #tpu.memory_space<vmem>>, vector<512x512xbf16>
    %c0_5 = arith.constant 0 : index
    %c0_6 = arith.constant 0 : index
    %3 = vector.load %arg5[%c0_5, %c0_6] : memref<1x512xf32, #tpu.memory_space<vmem>>, vector<1x512xf32>
    %c0_7 = arith.constant 0 : index
    %c0_8 = arith.constant 0 : index
    %4 = vector.load %arg6[%c0_7, %c0_8] : memref<512x128xbf16, #tpu.memory_space<vmem>>, vector<512x128xbf16>
    %c0_9 = arith.constant 0 : index
    %c0_10 = arith.constant 0 : index
    %5 = vector.load %arg7[%c0_9, %c0_10] : memref<1x128xf32, #tpu.memory_space<vmem>>, vector<1x128xf32>
    %c0_11 = arith.constant 0 : index
    %c0_12 = arith.constant 0 : index
    %6 = vector.load %arg1[%c0_11, %c0_12] : memref<2x784xf32, #tpu.memory_space<vmem>>, vector<2x784xf32>
    %7 = arith.truncf %6 : vector<2x784xf32> to vector<2x784xbf16>
    %cst = arith.constant dense<0.000000e+00> : vector<2x512xf32>
    %8 = tpu.matmul %7, %0, %cst {dimension_numbers = #tpu.dot_dimension_numbers<[1], [0], [0], [1], [0, 0, 1, 1], [], []>} : vector<2x784xbf16>, vector<784x512xbf16>, vector<2x512xf32> -> vector<2x512xf32>
    %9 = vector.broadcast %1 : vector<1x512xf32> to vector<2x512xf32>
    %10 = arith.addf %8, %9 : vector<2x512xf32>
    %cst_13 = arith.constant 0.000000e+00 : f32
    %11 = vector.broadcast %cst_13 : f32 to vector<2x512xf32>
    %12 = arith.maximumf %10, %11 : vector<2x512xf32>
    %13 = arith.truncf %12 : vector<2x512xf32> to vector<2x512xbf16>
    %cst_14 = arith.constant dense<0.000000e+00> : vector<2x512xf32>
    %14 = tpu.matmul %13, %2, %cst_14 {dimension_numbers = #tpu.dot_dimension_numbers<[1], [0], [0], [1], [0, 0, 1, 1], [], []>} : vector<2x512xbf16>, vector<512x512xbf16>, vector<2x512xf32> -> vector<2x512xf32>
    %15 = vector.broadcast %3 : vector<1x512xf32> to vector<2x512xf32>
    %16 = arith.addf %14, %15 : vector<2x512xf32>
    %cst_15 = arith.constant 0.000000e+00 : f32
    %17 = vector.broadcast %cst_15 : f32 to vector<2x512xf32>
    %18 = arith.maximumf %16, %17 : vector<2x512xf32>
    %19 = arith.truncf %18 : vector<2x512xf32> to vector<2x512xbf16>
    %cst_16 = arith.constant dense<0.000000e+00> : vector<2x128xf32>
    %20 = tpu.matmul %19, %4, %cst_16 {dimension_numbers = #tpu.dot_dimension_numbers<[1], [0], [0], [1], [0, 0, 1, 1], [], []>} : vector<2x512xbf16>, vector<512x128xbf16>, vector<2x128xf32> -> vector<2x128xf32>
    %21 = vector.broadcast %5 : vector<1x128xf32> to vector<2x128xf32>
    %22 = arith.addf %20, %21 : vector<2x128xf32>
    %cst_17 = arith.constant 0.000000e+00 : f32
    %23 = vector.broadcast %cst_17 : f32 to vector<2x128xf32>
    %24 = arith.maximumf %22, %23 : vector<2x128xf32>
    %c0_18 = arith.constant 0 : index
    %c0_19 = arith.constant 0 : index
    %25 = vector.load %arg8[%c0_18, %c0_19] : memref<2x128xf32, #tpu.memory_space<vmem>>, vector<2x128xf32>
    tpu.vector_store %arg8[%c0_18, %c0_19], %24 {strides = array<i32>} : memref<2x128xf32, #tpu.memory_space<vmem>>, vector<2x128xf32>,
    return
  }
  func.func @transform_0(%arg0: i32) -> (i32, i32) {
    %c0_i32 = arith.constant 0 : i32
    %c0_i32_0 = arith.constant 0 : i32
    return %arg0, %c0_i32 : i32, i32
  }
  func.func @transform_1(%arg0: i32) -> (i32, i32) {
    %c0_i32 = arith.constant 0 : i32
    %c0_i32_0 = arith.constant 0 : i32
    %c0_i32_1 = arith.constant 0 : i32
    return %c0_i32, %c0_i32_0 : i32, i32
  }
  func.func @transform_2(%arg0: i32) -> (i32, i32) {
    %c0_i32 = arith.constant 0 : i32
    %c0_i32_0 = arith.constant 0 : i32
    %c0_i32_1 = arith.constant 0 : i32
    return %c0_i32, %c0_i32_0 : i32, i32
  }
  func.func @transform_3(%arg0: i32) -> (i32, i32) {
    %c0_i32 = arith.constant 0 : i32
    %c0_i32_0 = arith.constant 0 : i32
    %c0_i32_1 = arith.constant 0 : i32
    return %c0_i32, %c0_i32_0 : i32, i32
  }
  func.func @transform_4(%arg0: i32) -> (i32, i32) {
    %c0_i32 = arith.constant 0 : i32
    %c0_i32_0 = arith.constant 0 : i32
    %c0_i32_1 = arith.constant 0 : i32
    return %c0_i32, %c0_i32_0 : i32, i32
  }
  func.func @transform_5(%arg0: i32) -> (i32, i32) {
    %c0_i32 = arith.constant 0 : i32
    %c0_i32_0 = arith.constant 0 : i32
    %c0_i32_1 = arith.constant 0 : i32
    return %c0_i32, %c0_i32_0 : i32, i32
  }
  func.func @transform_6(%arg0: i32) -> (i32, i32) {
    %c0_i32 = arith.constant 0 : i32
    %c0_i32_0 = arith.constant 0 : i32
    %c0_i32_1 = arith.constant 0 : i32
    return %c0_i32, %c0_i32_0 : i32, i32
  }
  func.func @transform_7(%arg0: i32) -> (i32, i32) {
    %c0_i32 = arith.constant 0 : i32
    %c0_i32_0 = arith.constant 0 : i32
    return %arg0, %c0_i32 : i32, i32
  }
}

</mosaic_0001>

<bundles_post_ra>
// kernel: tpu_custom_call.1
= control target key start
LH: loop header
LB: loop body
LE: loop exit
PB: predicated region body
PF: predicated region fallthrough
CT: control target
= control target key end

     0   :  { %12 = vsyncpa [#allocation3], 0  ;;  %s5213_s0 = inlined_call_operand.hbm [shape: f32[2,784], index: 0, kind: input, shape index: {}]   ;;  %s5214_s1 = inlined_call_operand.hbm [shape: bf16[784,512], index: 1, kind: input, shape index: {}]   ;;  %s5215_s2 = inlined_call_operand.hbm [shape: f32[1,512], index: 2, kind: input, shape index: {}]   ;;  %s5216_s3 = inlined_call_operand.hbm [shape: bf16[512,512], index: 3, kind: input, shape index: {}]   ;;  %s5217_s4 = inlined_call_operand.hbm [shape: f32[1,512], index: 4, kind: input, shape index: {}]   ;;  %s5218_s5 = inlined_call_operand.hbm [shape: bf16[512,128], index: 5, kind: input, shape index: {}]   ;;  %s5219_s6 = inlined_call_operand.vmem [shape: f32[1,128], index: 6, kind: input, shape index: {}]   ;;  %s5220_s7 = inlined_call_operand.hbm [shape: f32[2,128], index: 7, kind: output, shape index: {}]  }
   0x1   :  { %13 = vsyncpa [#allocation6], 0 }
   0x2   :  { %14 = vsyncpa [#allocation9], 0 }
   0x3   :  { %15 = vsyncpa [#allocation12], 0  ;;  %s32_s26 = sshll.u32 %s5214_s1, 4  ;;  %s33_s26 = int_to_ptr.hbm [resolvable:$true] %s32_s26 }
   0x4   :  { %16 = vsyncpa [#allocation4], 0  ;;  %s5008_s27 = smov [#allocation5]   ;;  %s56_s8 = sshll.u32 %s5216_s3, 4  ;;  %s57_s8 = int_to_ptr.hbm [resolvable:$true] %s56_s8 }
   0x5   :  { %s34_s28 = sshll.u32 %s5008_s27, 4  ;;  %s5009_s9 = smov 256   ;;  %s35_s28 = int_to_ptr.vmem [resolvable:$true] %s34_s28 }
   0x6   :  { %s5010_s10 = smov 16   ;;  %s5011_s11 = smov [#allocation8]  }
   0x7   :  { %40 = dma.hbm_to_vmem [thread:$0]  %s33_s26, 25088, %s35_s28, [#allocation6], %s5009_s9, %s5009_s9, %s5010_s10  }
   0x8   :  { %s58_s12 = sshll.u32 %s5011_s11, 4  ;;  %s22_s15 = sshll.u32 %s5213_s0, 4  ;;  %s59_s12 = int_to_ptr.vmem [resolvable:$true] %s58_s12  ;;  %s23_s15 = int_to_ptr.hbm [resolvable:$true] %s22_s15 }
   0x9   :  { %64 = dma.hbm_to_vmem [thread:$0]  %s57_s8, 16384, %s59_s12, [#allocation9], %s5009_s9, %s5009_s9, %s5010_s10  }
   0xa   :  { %s46_s17 = sshll.u32 %s5215_s2, 4  ;;  %s5012_s18 = smov [#allocation2]   ;;  %s47_s17 = int_to_ptr.hbm [resolvable:$true] %s46_s17 }
   0xb   :  { %s24_s19 = sshll.u32 %s5012_s18, 4  ;;  %s5013_s3 = smov [#allocation7]   ;;  %s25_s19 = int_to_ptr.vmem [resolvable:$true] %s24_s19 }
   0xc   :  { %27 = dma.hbm_to_vmem [thread:$0]  %s23_s15, 224, %s25_s19, [#allocation3]  }
   0xd   :  { %s48_s20 = sshll.u32 %s5013_s3, 4  ;;  %s70_s23 = sshll.u32 %s5217_s4, 4  ;;  %s49_s20 = int_to_ptr.vmem [resolvable:$true] %s48_s20  ;;  %s71_s23 = int_to_ptr.hbm [resolvable:$true] %s70_s23 }
   0xe   :  { %51 = dma.hbm_to_vmem [thread:$0]  %s47_s17, 64, %s49_s20, [#allocation6]  }
   0xf   :  { %s80_s25 = sshll.u32 %s5218_s5, 4  ;;  %s5014_s26 = smov [#allocation10]   ;;  %s81_s25 = int_to_ptr.hbm [resolvable:$true] %s80_s25 }
  0x10   :  { %s72_s2 = sshll.u32 %s5014_s26, 4  ;;  %s5015_s27 = smov [#allocation11]   ;;  %s73_s2 = int_to_ptr.vmem [resolvable:$true] %s72_s2 }
  0x11   :  { %75 = dma.hbm_to_vmem [thread:$0]  %s71_s23, 64, %s73_s2, [#allocation9]  }
  0x12   :  { %s82_s28 = sshll.u32 %s5015_s27, 4  ;;  %s5016_s29 = smov 64   ;;  %s83_s28 = int_to_ptr.vmem [resolvable:$true] %s82_s28 }
  0x13   :  { %s5017_s30 = smov 4  }
  0x14   :  { %88 = dma.hbm_to_vmem [thread:$0]  %s81_s25, 4096, %s83_s28, [#allocation12], %s5016_s29, %s5016_s29, %s5017_s30  }
  0x15   :  { %4998 = dma.done.wait [#allocation3], 224  }
  0x16   :  { %4999 = vsyncadd [#allocation3], 4294967072 }
  0x17   :  { %5000 = dma.done.wait [#allocation6], 25152  }
  0x18   :  { %5001 = vsyncadd [#allocation6], 4294942144 }
  0x19   :  { %5002 = dma.done.wait [#allocation9], 16448  }
  0x1a   :  { %5003 = vsyncadd [#allocation9], 4294950848 }
  0x1b   :  { %5004 = dma.done.wait [#allocation12], 4096  }
  0x1c   :  { %5005 = vsyncadd [#allocation12], 4294963200  ;;  %v3148_v0 = vld [vmem:[#allocation5 + $0xe0] sm:$0xf]  ;;  %v4492_v1 = vld [vmem:[#allocation5 + $0xec] sm:$0xf0] }
  0x1d   :  { %v3276_v2 = vld [vmem:[#allocation5 + $0x1e0] sm:$0xf]  ;;  %v3149_v3 = vor.u32 %v4492_v1, %v3148_v0  ;;  %v4524_v4 = vld [vmem:[#allocation5 + $0x1ec] sm:$0xf0]  ;;  %vm1524_vm0 = vcmask 130048   ;;  %s5018_s8 = smov [#allocation13]  }
  0x1e   :  { %v3404_v5 = vld [vmem:[#allocation5 + $0x2e0] sm:$0xf]  ;;  %v4556_v6 = vld [vmem:[#allocation5 + $0x2ec] sm:$0xf0]  ;;  %v3277_v7 = vor.u32 %v4524_v4, %v3276_v2  ;;  %s3019_s9 = sshll.u32 %s5018_s8, 4  ;;  %s3021_s12 = sshll.u32 %s5220_s7, 4  ;;  %s3020_s9 = int_to_ptr.vmem [resolvable:$true] %s3019_s9  ;;  %s3022_s12 = int_to_ptr.hbm [resolvable:$true] %s3021_s12 }
  0x1f   :  { %v3405_v8 = vor.u32 %v4556_v6, %v3404_v5  ;;  %v3532_v9 = vld [vmem:[#allocation5 + $0x3e0] sm:$0xf]  ;;  %v4588_v10 = vld [vmem:[#allocation5 + $0x3ec] sm:$0xf0]  ;;  %1528 = vmatpush.bf16.msra.mxu0 %v3149_v3 }
  0x20   :  { %v3132_v11 = vld [vmem:[#allocation5 + $0xc0] sm:$0xf]  ;;  %v3533_v12 = vor.u32 %v4588_v10, %v3532_v9  ;;  %v4488_v13 = vld [vmem:[#allocation5 + $0xcc] sm:$0xf0]  ;;  %1541 = vmatpush.bf16.msra.mxu1 %v3277_v7 }
  0x21   :  { %v3260_v14 = vld [vmem:[#allocation5 + $0x1c0] sm:$0xf]  ;;  %v4520_v15 = vld [vmem:[#allocation5 + $0x1cc] sm:$0xf0]  ;;  %1554 = vmatpush.bf16.msra.mxu2 %v3405_v8  ;;  %v3133_v16 = vor.u32 %v4488_v13, %v3132_v11 }
  0x22   :  { %v3261_v17 = vor.u32 %v4520_v15, %v3260_v14  ;;  %v3388_v18 = vld [vmem:[#allocation5 + $0x2c0] sm:$0xf]  ;;  %v4552_v19 = vld [vmem:[#allocation5 + $0x2cc] sm:$0xf0]  ;;  %1567 = vmatpush.bf16.msra.mxu3 %v3533_v12 }
  0x23   :  { %v3516_v20 = vld [vmem:[#allocation5 + $0x3c0] sm:$0xf]  ;;  %v3389_v21 = vor.u32 %v4552_v19, %v3388_v18  ;;  %v4584_v22 = vld [vmem:[#allocation5 + $0x3cc] sm:$0xf0]  ;;  %1529 = vmatpush.bf16.msra.mxu0 %v3133_v16 }
  0x24   :  { %v3116_v23 = vld [vmem:[#allocation5 + $0xa0] sm:$0xf]  ;;  %v4484_v24 = vld [vmem:[#allocation5 + $0xac] sm:$0xf0]  ;;  %v3517_v25 = vor.u32 %v4584_v22, %v3516_v20  ;;  %1542 = vmatpush.bf16.msra.mxu1 %v3261_v17 }
  0x25   :  { %v3244_v26 = vld [vmem:[#allocation5 + $0x1a0] sm:$0xf]  ;;  %v4516_v27 = vld [vmem:[#allocation5 + $0x1ac] sm:$0xf0]  ;;  %v3117_v29 = vor.u32 %v4484_v24, %v3116_v23  ;;  %1555 = vmatpush.bf16.msra.mxu2 %v3389_v21 }
  0x26   :  { %v3372_v28 = vld [vmem:[#allocation5 + $0x2a0] sm:$0xf]  ;;  %v4548_v30 = vld [vmem:[#allocation5 + $0x2ac] sm:$0xf0]  ;;  %v3245_v33 = vor.u32 %v4516_v27, %v3244_v26  ;;  %1568 = vmatpush.bf16.msra.mxu3 %v3517_v25 }
  0x27   :  { %v3500_v31 = vld [vmem:[#allocation5 + $0x3a0] sm:$0xf]  ;;  %v4580_v32 = vld [vmem:[#allocation5 + $0x3ac] sm:$0xf0]  ;;  %v3373_v34 = vor.u32 %v4548_v30, %v3372_v28  ;;  %1530 = vmatpush.bf16.msra.mxu0 %v3117_v29 }
  0x28   :  { %v3100_v35 = vld [vmem:[#allocation5 + $0x80] sm:$0xf]  ;;  %v4480_v36 = vld [vmem:[#allocation5 + $0x8c] sm:$0xf0]  ;;  %v3501_v38 = vor.u32 %v4580_v32, %v3500_v31  ;;  %1543 = vmatpush.bf16.msra.mxu1 %v3245_v33 }
  0x29   :  { %v3228_v37 = vld [vmem:[#allocation5 + $0x180] sm:$0xf]  ;;  %v4512_v39 = vld [vmem:[#allocation5 + $0x18c] sm:$0xf0]  ;;  %v3101_v44 = vor.u32 %v4480_v36, %v3100_v35  ;;  %1556 = vmatpush.bf16.msra.mxu2 %v3373_v34  ;;  %v4490_v34 = vld [vmem:[#allocation5 + $0xe4] sm:$0xf] }
  0x2a   :  { %v3356_v40 = vld [vmem:[#allocation5 + $0x280] sm:$0xf]  ;;  %v4544_v41 = vld [vmem:[#allocation5 + $0x28c] sm:$0xf0]  ;;  %v3229_v45 = vor.u32 %v4512_v39, %v3228_v37  ;;  %1569 = vmatpush.bf16.msra.mxu3 %v3501_v38  ;;  %v3150_v35 = vld [vmem:[#allocation5 + $0xf0] sm:$0xf0] }
  0x2b   :  { %v3484_v42 = vld [vmem:[#allocation5 + $0x380] sm:$0xf]  ;;  %v4576_v43 = vld [vmem:[#allocation5 + $0x38c] sm:$0xf0]  ;;  %v3357_v46 = vor.u32 %v4544_v41, %v3356_v40  ;;  %1531 = vmatpush.bf16.msra.mxu0 %v3101_v44  ;;  %v4522_v40 = vld [vmem:[#allocation5 + $0x1e4] sm:$0xf] }
  0x2c   :  { %v3084_v47 = vld [vmem:[#allocation5 + $0x60] sm:$0xf]  ;;  %v4476_v48 = vld [vmem:[#allocation5 + $0x6c] sm:$0xf0]  ;;  %v3485_v50 = vor.u32 %v4576_v43, %v3484_v42  ;;  %1544 = vmatpush.bf16.msra.mxu1 %v3229_v45  ;;  %v3278_v41 = vld [vmem:[#allocation5 + $0x1f0] sm:$0xf0] }
  0x2d   :  { %v3212_v49 = vld [vmem:[#allocation5 + $0x160] sm:$0xf]  ;;  %v4508_v51 = vld [vmem:[#allocation5 + $0x16c] sm:$0xf0]  ;;  %v3085_v56 = vor.u32 %v4476_v48, %v3084_v47  ;;  %1557 = vmatpush.bf16.msra.mxu2 %v3357_v46  ;;  %v3153_v48 = vor.u32 %v4490_v34, %v3150_v35 }
  0x2e   :  { %v3340_v52 = vld [vmem:[#allocation5 + $0x260] sm:$0xf]  ;;  %v4540_v53 = vld [vmem:[#allocation5 + $0x26c] sm:$0xf0]  ;;  %v3213_v57 = vor.u32 %v4508_v51, %v3212_v49  ;;  %1570 = vmatpush.bf16.msra.mxu3 %v3485_v50  ;;  %v4486_v50 = vld [vmem:[#allocation5 + $0xc4] sm:$0xf] }
  0x2f   :  { %v3468_v54 = vld [vmem:[#allocation5 + $0x360] sm:$0xf]  ;;  %v4572_v55 = vld [vmem:[#allocation5 + $0x36c] sm:$0xf0]  ;;  %v3341_v58 = vor.u32 %v4540_v53, %v3340_v52  ;;  %1532 = vmatpush.bf16.msra.mxu0 %v3085_v56  ;;  %v3134_v51 = vld [vmem:[#allocation5 + $0xd0] sm:$0xf0] }
  0x30   :  { %v3068_v59 = vld [vmem:[#allocation5 + $0x40] sm:$0xf]  ;;  %v4472_v60 = vld [vmem:[#allocation5 + $0x4c] sm:$0xf0]  ;;  %v3469_v62 = vor.u32 %v4572_v55, %v3468_v54  ;;  %1545 = vmatpush.bf16.msra.mxu1 %v3213_v57 }
  0x31   :  { %v3196_v61 = vld [vmem:[#allocation5 + $0x140] sm:$0xf]  ;;  %v4504_v63 = vld [vmem:[#allocation5 + $0x14c] sm:$0xf0]  ;;  %v3069_v4 = vor.u32 %v4472_v60, %v3068_v59  ;;  %1558 = vmatpush.bf16.msra.mxu2 %v3341_v58  ;;  %v3281_v59 = vor.u32 %v4522_v40, %v3278_v41 }
  0x32   :  { %v3324_v0 = vld [vmem:[#allocation5 + $0x240] sm:$0xf]  ;;  %v4536_v1 = vld [vmem:[#allocation5 + $0x24c] sm:$0xf0]  ;;  %v3197_v6 = vor.u32 %v4504_v63, %v3196_v61  ;;  %1571 = vmatpush.bf16.msra.mxu3 %v3469_v62  ;;  %v4518_v61 = vld [vmem:[#allocation5 + $0x1c4] sm:$0xf] }
  0x33   :  { %v3452_v2 = vld [vmem:[#allocation5 + $0x340] sm:$0xf]  ;;  %v4568_v3 = vld [vmem:[#allocation5 + $0x34c] sm:$0xf0]  ;;  %v3325_v7 = vor.u32 %v4536_v1, %v3324_v0  ;;  %1533 = vmatpush.bf16.msra.mxu0 %v3069_v4  ;;  %v3262_v62 = vld [vmem:[#allocation5 + $0x1d0] sm:$0xf0]  ;;  %v3137_v1 = vor.u32 %v4486_v50, %v3134_v51 }
  0x34   :  { %v3052_v5 = vld [vmem:[#allocation5 + $0x20] sm:$0xf]  ;;  %v4468_v8 = vld [vmem:[#allocation5 + $0x2c] sm:$0xf0]  ;;  %v3453_v11 = vor.u32 %v4568_v3, %v3452_v2  ;;  %1546 = vmatpush.bf16.msra.mxu1 %v3197_v6  ;;  %v4482_v6 = vld [vmem:[#allocation5 + $0xa4] sm:$0xf] }
  0x35   :  { %v3180_v9 = vld [vmem:[#allocation5 + $0x120] sm:$0xf]  ;;  %v4500_v10 = vld [vmem:[#allocation5 + $0x12c] sm:$0xf0]  ;;  %v3053_v18 = vor.u32 %v4468_v8, %v3052_v5  ;;  %1559 = vmatpush.bf16.msra.mxu2 %v3325_v7  ;;  %v3118_v7 = vld [vmem:[#allocation5 + $0xb0] sm:$0xf0] }
  0x36   :  { %v3308_v12 = vld [vmem:[#allocation5 + $0x220] sm:$0xf]  ;;  %v4532_v13 = vld [vmem:[#allocation5 + $0x22c] sm:$0xf0]  ;;  %v3181_v22 = vor.u32 %v4500_v10, %v3180_v9  ;;  %1572 = vmatpush.bf16.msra.mxu3 %v3453_v11  ;;  %v3265_v9 = vor.u32 %v4518_v61, %v3262_v62  ;;  %v4514_v11 = vld [vmem:[#allocation5 + $0x1a4] sm:$0xf] }
  0x37   :  { %v3436_v14 = vld [vmem:[#allocation5 + $0x320] sm:$0xf]  ;;  %v4564_v15 = vld [vmem:[#allocation5 + $0x32c] sm:$0xf0]  ;;  %v3309_v23 = vor.u32 %v4532_v13, %v3308_v12  ;;  %1534 = vmatpush.bf16.msra.mxu0 %v3053_v18  ;;  %v3246_v12 = vld [vmem:[#allocation5 + $0x1b0] sm:$0xf0] }
  0x38   :  { %v3036_v16 = vld [vmem:[#allocation5] sm:$0xf]  ;;  %v4464_v17 = vld [vmem:[#allocation5 + $0xc] sm:$0xf0]  ;;  %v3437_v26 = vor.u32 %v4564_v15, %v3436_v14  ;;  %1547 = vmatpush.bf16.msra.mxu1 %v3181_v22  ;;  %v3121_v14 = vor.u32 %v4482_v6, %v3118_v7  ;;  %v3249_v22 = vor.u32 %v4514_v11, %v3246_v12  ;;  %v4498_v62 = vld [vmem:[#allocation5 + $0x124] sm:$0xf] }
  0x39   :  { %v3164_v19 = vld [vmem:[#allocation5 + $0x100] sm:$0xf]  ;;  %v4496_v20 = vld [vmem:[#allocation5 + $0x10c] sm:$0xf0]  ;;  %v3037_v33 = vor.u32 %v4464_v17, %v3036_v16  ;;  %1560 = vmatpush.bf16.msra.mxu2 %v3309_v23  ;;  %v3038_v11 = vld [vmem:[#allocation5 + $0x10] sm:$0xf0] }
  0x3a   :  { %v507_v21 = vld [vmem:[#allocation2] sm:$0xff]  ;;  %v3292_v24 = vld [vmem:[#allocation5 + $0x200] sm:$0xf]  ;;  %v3165_v37 = vor.u32 %v4496_v20, %v3164_v19  ;;  %1573 = vmatpush.bf16.msra.mxu3 %v3437_v26  ;;  %v4478_v19 = vld [vmem:[#allocation5 + $0x84] sm:$0xf] }
  0x3b   :  { %v4528_v25 = vld [vmem:[#allocation5 + $0x20c] sm:$0xf0]  ;;  %511 = vst [vmem:[#allocation1] ss:$4 sm:$0xff] %v507_v21  ;;  %v3420_v27 = vld [vmem:[#allocation5 + $0x300] sm:$0xf]  ;;  %1535 = vmatpush.bf16.msra.mxu0 %v3037_v33 }
  0x3c   :  { %v4560_v28 = vld [vmem:[#allocation5 + $0x30c] sm:$0xf0]  ;;  %v3660_v29 = vld [vmem:[#allocation5 + $0x4e0] sm:$0xf]  ;;  %v3293_v38 = vor.u32 %v4528_v25, %v3292_v24  ;;  %1548 = vmatpush.bf16.msra.mxu1 %v3165_v37  ;;  %v3102_v20 = vld [vmem:[#allocation5 + $0x90] sm:$0xf0] }
  0x3d   :  { %v4620_v30 = vld [vmem:[#allocation5 + $0x4ec] sm:$0xf0]  ;;  %v3788_v31 = vld [vmem:[#allocation5 + $0x5e0] sm:$0xf]  ;;  %v3421_v42 = vor.u32 %v4560_v28, %v3420_v27  ;;  %v4510_v21 = vld [vmem:[#allocation5 + $0x184] sm:$0xf]  ;;  %v3105_v28 = vor.u32 %v4478_v19, %v3102_v20 }
  0x3e   :  { %v4652_v32 = vld [vmem:[#allocation5 + $0x5ec] sm:$0xf0]  ;;  %v3804_v36 = vld [vmem:[#allocation5 + $0x600] sm:$0xf]  ;;  %v3661_v43 = vor.u32 %v4620_v30, %v3660_v29  ;;  %1561 = vmatpush.bf16.msra.mxu2 %v3293_v38  ;;  %v3230_v24 = vld [vmem:[#allocation5 + $0x190] sm:$0xf0] }
  0x3f   :  { %v4656_v39 = vld [vmem:[#allocation5 + $0x60c] sm:$0xf0]  ;;  %v3644_v44 = vld [vmem:[#allocation5 + $0x4c0] sm:$0xf]  ;;  %v3789_v47 = vor.u32 %v4652_v32, %v3788_v31  ;;  %1574 = vmatpush.bf16.msra.mxu3 %v3421_v42  ;;  %v508_v31 = vld [vmem:[#allocation2 + $0x8] sm:$0x3f]  ;;  %v3233_v34 = vor.u32 %v4510_v21, %v3230_v24 }
  0x40   :  { %v4616_v45 = vld [vmem:[#allocation5 + $0x4cc] sm:$0xf0]  ;;  %v3772_v46 = vld [vmem:[#allocation5 + $0x5c0] sm:$0xf]  ;;  %v3805_v55 = vor.u32 %v4656_v39, %v3804_v36  ;;  %1580 = vmatpush.bf16.msrb.mxu0 %v3661_v43  ;;  %v4474_v32 = vld [vmem:[#allocation5 + $0x64] sm:$0xf] }
  0x41   :  { %v4648_v49 = vld [vmem:[#allocation5 + $0x5cc] sm:$0xf0]  ;;  %v3645_v60 = vor.u32 %v4616_v45, %v3644_v44  ;;  %1593 = vmatpush.bf16.msrb.mxu1 %v3789_v47  ;;  %v3628_v2 = vld [vmem:[#allocation5 + $0x4a0] sm:$0xf]  ;;  %v3086_v33 = vld [vmem:[#allocation5 + $0x70] sm:$0xf0] }
  0x42   :  { %v516_v52 = vld.sshfl [vmem:[#allocation1 + $0x10] sm:$0xff pattern:$0x73625140]  ;;  %v514_v53 = vld.sshfl [vmem:[#allocation1] sm:$0xff pattern:$0x73625140]  ;;  %v3773_v0 = vor.u32 %v4648_v49, %v3772_v46  ;;  %1613 = vmatpush.bf16.msrb.mxu2 %v3805_v55  ;;  %v3089_v39 = vor.u32 %v4474_v32, %v3086_v33 }
  0x43   :  { %v5077_v54 = vpack.c.bf16 %v516_v52, %v516_v52  ;;  %v5079_v56 = vpack.c.bf16 %v514_v53, %v514_v53  ;;  %v517_v57 = vld.sshfl [vmem:[#allocation1 + $0x18] sm:$0xff pattern:$0x73625140]  ;;  %v515_v58 = vld.sshfl [vmem:[#allocation1 + $0x8] sm:$0xff pattern:$0x73625140]  ;;  %1619 = vmatpush.bf16.msrb.mxu3 %v3153_v48 }
  0x44   :  { %v5081_v63 = vpack.c.bf16 %v517_v57, %v517_v57  ;;  %v4612_v3 = vld [vmem:[#allocation5 + $0x4ac] sm:$0xf0]  ;;  %v3756_v4 = vld [vmem:[#allocation5 + $0x5a0] sm:$0xf]  ;;  %v5085_v8 = vpack.c.bf16 %v515_v58, %v515_v58  ;;  %1581 = vmatpush.bf16.msrb.mxu0 %v3645_v60  ;;  %513 = vst [vmem:[#allocation1 + $0x20] ss:$4 sm:$0xff] %v508_v31 }
  0x45   :  { %1562 = vmatmul.bf16.vlgmr.msra.gmra.mxu2 %v5077_v54  ;;  %1536 = vmatmul.bf16.vlgmr.msra.gmra.mxu0 %v5079_v56  ;;  %v4644_v5 = vld [vmem:[#allocation5 + $0x5ac] sm:$0xf0]  ;;  %v3629_v10 = vor.u32 %v4612_v3, %v3628_v2  ;;  %v3612_v15 = vld [vmem:[#allocation5 + $0x480] sm:$0xf]  ;;  %v4506_v36 = vld [vmem:[#allocation5 + $0x164] sm:$0xf] }
  0x46   :  { %1575 = vmatmul.bf16.vlgmr.msra.gmra.mxu3 %v5081_v63  ;;  %1632 = vmatpush.bf16.msra.mxu2 %v3281_v59  ;;  %v3757_v13 = vor.u32 %v4644_v5, %v3756_v4  ;;  %v4608_v16 = vld [vmem:[#allocation5 + $0x48c] sm:$0xf0]  ;;  %v3740_v17 = vld [vmem:[#allocation5 + $0x580] sm:$0xf]  ;;  %v3214_v37 = vld [vmem:[#allocation5 + $0x170] sm:$0xf0] }
  0x47   :  { %1594 = vmatpush.bf16.msrb.mxu1 %v3773_v0  ;;  %1620 = vmatpush.bf16.msrb.mxu3 %v3137_v1  ;;  %v4640_v18 = vld [vmem:[#allocation5 + $0x58c] sm:$0xf0]  ;;  %v3613_v23 = vor.u32 %v4608_v16, %v3612_v15  ;;  %v3596_v25 = vld [vmem:[#allocation5 + $0x460] sm:$0xf]  ;;  %v4470_v44 = vld [vmem:[#allocation5 + $0x44] sm:$0xf]  ;;  %v3217_v47 = vor.u32 %v4506_v36, %v3214_v37 }
  0x48   :  { %1549 = vmatmul.bf16.vlgmr.msra.gmra.mxu1 %v5085_v8  ;;  %1582 = vmatpush.bf16.msrb.mxu0 %v3629_v10  ;;  %v4604_v26 = vld [vmem:[#allocation5 + $0x46c] sm:$0xf0]  ;;  %v3741_v27 = vor.u32 %v4640_v18, %v3740_v17  ;;  %v3724_v29 = vld [vmem:[#allocation5 + $0x560] sm:$0xf]  ;;  %v3070_v45 = vld [vmem:[#allocation5 + $0x50] sm:$0xf0] }
  0x49   :  { %v4636_v30 = vld [vmem:[#allocation5 + $0x56c] sm:$0xf0]  ;;  %v3597_v35 = vor.u32 %v4604_v26, %v3596_v25  ;;  %v3580_v40 = vld [vmem:[#allocation5 + $0x440] sm:$0xf]  ;;  %v4502_v46 = vld [vmem:[#allocation5 + $0x144] sm:$0xf]  ;;  %v3073_v53 = vor.u32 %v4470_v44, %v3070_v45 }
  0x4a   :  { %1633 = vmatpush.bf16.msra.mxu2 %v3265_v9  ;;  %v3725_v38 = vor.u32 %v4636_v30, %v3724_v29  ;;  %v4600_v41 = vld [vmem:[#allocation5 + $0x44c] sm:$0xf0]  ;;  %v3708_v42 = vld [vmem:[#allocation5 + $0x540] sm:$0xf]  ;;  %v3198_v49 = vld [vmem:[#allocation5 + $0x150] sm:$0xf0] }
  0x4b   :  { %1595 = vmatpush.bf16.msrb.mxu1 %v3757_v13  ;;  %1621 = vmatpush.bf16.msrb.mxu3 %v3121_v14  ;;  %v4632_v43 = vld [vmem:[#allocation5 + $0x54c] sm:$0xf0]  ;;  %v3581_v48 = vor.u32 %v4600_v41, %v3580_v40  ;;  %v3564_v50 = vld [vmem:[#allocation5 + $0x420] sm:$0xf]  ;;  %v4466_v59 = vld [vmem:[#allocation5 + $0x24] sm:$0xf]  ;;  %v3201_v1 = vor.u32 %v4502_v46, %v3198_v49 }
  0x4c   :  { %1583 = vmatpush.bf16.msrb.mxu0 %v3613_v23  ;;  %v4596_v51 = vld [vmem:[#allocation5 + $0x42c] sm:$0xf0]  ;;  %v3709_v52 = vor.u32 %v4632_v43, %v3708_v42  ;;  %v3692_v55 = vld [vmem:[#allocation5 + $0x520] sm:$0xf]  ;;  %v3054_v60 = vld [vmem:[#allocation5 + $0x30] sm:$0xf0] }
  0x4d   :  { %v520_v57 = vld.sshfl [vmem:[#allocation1 + $0x30] sm:$0xff pattern:$0x73625140]  ;;  %v4628_v58 = vld [vmem:[#allocation5 + $0x52c] sm:$0xf0]  ;;  %v3565_v2 = vor.u32 %v4596_v51, %v3564_v50  ;;  %v3057_v7 = vor.u32 %v4466_v59, %v3054_v60 }
  0x4e   :  { %1634 = vmatpush.bf16.msra.mxu2 %v3249_v22  ;;  %v5089_v61 = vpack.c.bf16 %v520_v57, %v520_v57  ;;  %v3182_v0 = vld [vmem:[#allocation5 + $0x130] sm:$0xf0]  ;;  %v3548_v3 = vld [vmem:[#allocation5 + $0x400] sm:$0xf]  ;;  %v4592_v4 = vld [vmem:[#allocation5 + $0x40c] sm:$0xf0]  ;;  %v3693_v6 = vor.u32 %v4628_v58, %v3692_v55 }
  0x4f   :  { %1596 = vmatpush.bf16.msrb.mxu1 %v3741_v27  ;;  %1622 = vmatpush.bf16.msrb.mxu3 %v3105_v28  ;;  %v3676_v5 = vld [vmem:[#allocation5 + $0x500] sm:$0xf]  ;;  %v4624_v9 = vld [vmem:[#allocation5 + $0x50c] sm:$0xf0]  ;;  %v4462_v10 = vld [vmem:[#allocation5 + $0x4] sm:$0xf]  ;;  %v3185_v18 = vor.u32 %v4498_v62, %v3182_v0  ;;  %v3549_v19 = vor.u32 %v4592_v4, %v3548_v3 }
  0x50   :  { %1584 = vmatpush.bf16.msrb.mxu0 %v3597_v35  ;;  %v4554_v12 = vld [vmem:[#allocation5 + $0x2e4] sm:$0xf]  ;;  %v3406_v13 = vld [vmem:[#allocation5 + $0x2f0] sm:$0xf0]  ;;  %v3677_v22 = vor.u32 %v4624_v9, %v3676_v5  ;;  %v3041_v23 = vor.u32 %v4462_v10, %v3038_v11 }
  0x51   :  { %v4586_v14 = vld [vmem:[#allocation5 + $0x3e4] sm:$0xf]  ;;  %v3534_v15 = vld [vmem:[#allocation5 + $0x3f0] sm:$0xf0]  ;;  %v3409_v26 = vor.u32 %v4554_v12, %v3406_v13 }
  0x52   :  { %1635 = vmatpush.bf16.msra.mxu2 %v3233_v34  ;;  %v4618_v16 = vld [vmem:[#allocation5 + $0x4e4] sm:$0xf]  ;;  %v3662_v17 = vld [vmem:[#allocation5 + $0x4f0] sm:$0xf0]  ;;  %v3537_v27 = vor.u32 %v4586_v14, %v3534_v15 }
  0x53   :  { %1597 = vmatpush.bf16.msrb.mxu1 %v3725_v38  ;;  %1623 = vmatpush.bf16.msrb.mxu3 %v3089_v39  ;;  %v518_v20 = vld.sshfl [vmem:[#allocation1 + $0x20] sm:$0xff pattern:$0x73625140]  ;;  %v4494_v21 = vld [vmem:[#allocation5 + $0x104] sm:$0xf]  ;;  %v3665_v31 = vor.u32 %v4618_v16, %v3662_v17 }
  0x54   :  { %1585 = vmatpush.bf16.msrb.mxu0 %v3581_v48  ;;  %v3166_v24 = vld [vmem:[#allocation5 + $0x110] sm:$0xf0]  ;;  %v4650_v28 = vld [vmem:[#allocation5 + $0x5e4] sm:$0xf]  ;;  %v5093_v32 = vpack.c.bf16 %v518_v20, %v518_v20 }
  0x55   :  { %3818 = vmatmul.msk.bf16.vlgmr.msrb.gmra.mxu2 %vm1524_vm0, %v5089_v61  ;;  %v519_v25 = vld.sshfl [vmem:[#allocation1 + $0x28] sm:$0xff pattern:$0x73625140]  ;;  %v4550_v30 = vld [vmem:[#allocation5 + $0x2c4] sm:$0xf]  ;;  %v3169_v36 = vor.u32 %v4494_v21, %v3166_v24 }
  0x56   :  { %1636 = vmatpush.bf16.msra.mxu2 %v3217_v47  ;;  %v3790_v29 = vld [vmem:[#allocation5 + $0x5f0] sm:$0xf0]  ;;  %v4582_v34 = vld [vmem:[#allocation5 + $0x3c4] sm:$0xf]  ;;  %v5095_v37 = vpack.c.bf16 %v519_v25, %v519_v25 }
  0x57   :  { %1598 = vmatpush.bf16.msrb.mxu1 %v3709_v52  ;;  %1624 = vmatpush.bf16.msrb.mxu3 %v3073_v53  ;;  %v3390_v33 = vld [vmem:[#allocation5 + $0x2d0] sm:$0xf0]  ;;  %v4614_v38 = vld [vmem:[#allocation5 + $0x4c4] sm:$0xf]  ;;  %v3793_v40 = vor.u32 %v4650_v28, %v3790_v29 }
  0x58   :  { %1586 = vmatpush.bf16.msrb.mxu0 %v3565_v2  ;;  %v3518_v35 = vld [vmem:[#allocation5 + $0x3d0] sm:$0xf0]  ;;  %v3393_v41 = vor.u32 %v4550_v30, %v3390_v33  ;;  %v4646_v43 = vld [vmem:[#allocation5 + $0x5c4] sm:$0xf] }
  0x59   :  { %v3646_v39 = vld [vmem:[#allocation5 + $0x4d0] sm:$0xf0]  ;;  %v3521_v42 = vor.u32 %v4582_v34, %v3518_v35  ;;  %v4546_v45 = vld [vmem:[#allocation5 + $0x2a4] sm:$0xf] }
  0x5a   :  { %1637 = vmatpush.bf16.msra.mxu2 %v3201_v1  ;;  %v3774_v44 = vld [vmem:[#allocation5 + $0x5d0] sm:$0xf0]  ;;  %v3649_v46 = vor.u32 %v4614_v38, %v3646_v39  ;;  %v4578_v48 = vld [vmem:[#allocation5 + $0x3a4] sm:$0xf] }
  0x5b   :  { %1599 = vmatpush.bf16.msrb.mxu1 %v3693_v6  ;;  %1625 = vmatpush.bf16.msrb.mxu3 %v3057_v7  ;;  %v3374_v47 = vld [vmem:[#allocation5 + $0x2b0] sm:$0xf0]  ;;  %v4610_v50 = vld [vmem:[#allocation5 + $0x4a4] sm:$0xf]  ;;  %v3777_v52 = vor.u32 %v4646_v43, %v3774_v44 }
  0x5c   :  { %1587 = vmatpush.bf16.msrb.mxu0 %v3549_v19  ;;  %v3502_v49 = vld [vmem:[#allocation5 + $0x3b0] sm:$0xf0]  ;;  %v3377_v53 = vor.u32 %v4546_v45, %v3374_v47  ;;  %v4642_v57 = vld [vmem:[#allocation5 + $0x5a4] sm:$0xf] }
  0x5d   :  { %v3630_v51 = vld [vmem:[#allocation5 + $0x4b0] sm:$0xf0]  ;;  %v3505_v55 = vor.u32 %v4578_v48, %v3502_v49  ;;  %v4542_v59 = vld [vmem:[#allocation5 + $0x284] sm:$0xf] }
  0x5e   :  { %1638 = vmatpush.bf16.msra.mxu2 %v3185_v18  ;;  %v3758_v58 = vld [vmem:[#allocation5 + $0x5b0] sm:$0xf0]  ;;  %v3633_v60 = vor.u32 %v4610_v50, %v3630_v51  ;;  %v4574_v0 = vld [vmem:[#allocation5 + $0x384] sm:$0xf] }
  0x5f   :  { %1600 = vmatpush.bf16.msrb.mxu1 %v3677_v22  ;;  %1626 = vmatpush.bf16.msrb.mxu3 %v3041_v23  ;;  %v3358_v62 = vld [vmem:[#allocation5 + $0x290] sm:$0xf0]  ;;  %v4606_v2 = vld [vmem:[#allocation5 + $0x484] sm:$0xf]  ;;  %v3761_v4 = vor.u32 %v4642_v57, %v3758_v58  ;;  %v3156_v57 = vld [vmem:[#allocation5 + $0xe8] sm:$0xf] }
  0x60   :  { %1645 = vmatpush.bf16.msra.mxu0 %v3409_v26  ;;  %v3486_v1 = vld [vmem:[#allocation5 + $0x390] sm:$0xf0]  ;;  %v3361_v5 = vor.u32 %v4542_v59, %v3358_v62  ;;  %v4638_v7 = vld [vmem:[#allocation5 + $0x584] sm:$0xf]  ;;  %v4493_v58 = vld [vmem:[#allocation5 + $0xf4] sm:$0xf0] }
  0x61   :  { %1588 = vmatmul.bf16.vlgmr.msrb.gmra.mxu0 %v5093_v32  ;;  %v3614_v3 = vld [vmem:[#allocation5 + $0x490] sm:$0xf0]  ;;  %v3489_v6 = vor.u32 %v4574_v0, %v3486_v1  ;;  %v4538_v10 = vld [vmem:[#allocation5 + $0x264] sm:$0xf]  ;;  %v3412_v0 = vld [vmem:[#allocation5 + $0x2e8] sm:$0xf] }
  0x62   :  { %1639 = vmatpush.bf16.msra.mxu2 %v3169_v36  ;;  %1601 = vmatmul.bf16.vlgmr.msrb.gmra.mxu1 %v5095_v37  ;;  %v3742_v9 = vld [vmem:[#allocation5 + $0x590] sm:$0xf0]  ;;  %v3617_v11 = vor.u32 %v4606_v2, %v3614_v3  ;;  %v4570_v13 = vld [vmem:[#allocation5 + $0x364] sm:$0xf]  ;;  %v4557_v1 = vld [vmem:[#allocation5 + $0x2f4] sm:$0xf0] }
  0x63   :  { %1658 = vmatpush.bf16.msra.mxu1 %v3537_v27  ;;  %1671 = vmatpush.bf16.msra.mxu3 %v3665_v31  ;;  %v3342_v12 = vld [vmem:[#allocation5 + $0x270] sm:$0xf0]  ;;  %v4602_v15 = vld [vmem:[#allocation5 + $0x464] sm:$0xf]  ;;  %v3745_v17 = vor.u32 %v4638_v7, %v3742_v9  ;;  %v3157_v7 = vor.u32 %v4493_v58, %v3156_v57  ;;  %v3540_v9 = vld [vmem:[#allocation5 + $0x3e8] sm:$0xf] }
  0x64   :  { %1627 = vmatmul.bf16.vlgmr.msrb.gmra.mxu3 %v5079_v56  ;;  %1646 = vmatpush.bf16.msra.mxu0 %v3393_v41  ;;  %v3470_v14 = vld [vmem:[#allocation5 + $0x370] sm:$0xf0]  ;;  %v3345_v18 = vor.u32 %v4538_v10, %v3342_v12  ;;  %v4634_v20 = vld [vmem:[#allocation5 + $0x564] sm:$0xf]  ;;  %v4589_v10 = vld [vmem:[#allocation5 + $0x3f4] sm:$0xf0] }
  0x65   :  { %1640 = vmatmul.bf16.vlgmr.msra.gmra.mxu2 %v5085_v8  ;;  %v3598_v16 = vld [vmem:[#allocation5 + $0x470] sm:$0xf0]  ;;  %v3473_v19 = vor.u32 %v4570_v13, %v3470_v14  ;;  %v4534_v22 = vld [vmem:[#allocation5 + $0x244] sm:$0xf]  ;;  %v3284_v12 = vld [vmem:[#allocation5 + $0x1e8] sm:$0xf]  ;;  %v3413_v14 = vor.u32 %v4557_v1, %v3412_v0 }
  0x66   :  { %1684 = vmatpush.bf16.msrb.mxu2 %v3793_v40  ;;  %v3726_v21 = vld [vmem:[#allocation5 + $0x570] sm:$0xf0]  ;;  %v3601_v23 = vor.u32 %v4602_v15, %v3598_v16  ;;  %v4566_v25 = vld [vmem:[#allocation5 + $0x344] sm:$0xf]  ;;  %v4525_v13 = vld [vmem:[#allocation5 + $0x1f4] sm:$0xf0] }
  0x67   :  { %1659 = vmatpush.bf16.msra.mxu1 %v3521_v42  ;;  %1672 = vmatpush.bf16.msra.mxu3 %v3649_v46  ;;  %v3326_v24 = vld [vmem:[#allocation5 + $0x250] sm:$0xf0]  ;;  %v4598_v27 = vld [vmem:[#allocation5 + $0x444] sm:$0xf]  ;;  %v3729_v29 = vor.u32 %v4634_v20, %v3726_v21  ;;  %v3140_v16 = vld [vmem:[#allocation5 + $0xc8] sm:$0xf]  ;;  %v3285_v21 = vor.u32 %v4525_v13, %v3284_v12 }
  0x68   :  { %1647 = vmatpush.bf16.msra.mxu0 %v3377_v53  ;;  %v3454_v26 = vld [vmem:[#allocation5 + $0x350] sm:$0xf0]  ;;  %v3329_v30 = vor.u32 %v4534_v22, %v3326_v24  ;;  %v4630_v33 = vld [vmem:[#allocation5 + $0x544] sm:$0xf]  ;;  %v4553_v20 = vld [vmem:[#allocation5 + $0x2d4] sm:$0xf0] }
  0x69   :  { %v3582_v28 = vld [vmem:[#allocation5 + $0x450] sm:$0xf0]  ;;  %v3457_v31 = vor.u32 %v4566_v25, %v3454_v26  ;;  %v4530_v35 = vld [vmem:[#allocation5 + $0x224] sm:$0xf]  ;;  %v3524_v22 = vld [vmem:[#allocation5 + $0x3c8] sm:$0xf] }
  0x6a   :  { %1685 = vmatpush.bf16.msrb.mxu2 %v3777_v52  ;;  %v3710_v34 = vld [vmem:[#allocation5 + $0x550] sm:$0xf0]  ;;  %v3585_v36 = vor.u32 %v4598_v27, %v3582_v28  ;;  %v4562_v39 = vld [vmem:[#allocation5 + $0x324] sm:$0xf]  ;;  %v3268_v25 = vld [vmem:[#allocation5 + $0x1c8] sm:$0xf] }
  0x6b   :  { %1660 = vmatpush.bf16.msra.mxu1 %v3505_v55  ;;  %1673 = vmatpush.bf16.msra.mxu3 %v3633_v60  ;;  %v3310_v38 = vld [vmem:[#allocation5 + $0x230] sm:$0xf0]  ;;  %v4594_v41 = vld [vmem:[#allocation5 + $0x424] sm:$0xf]  ;;  %v3713_v43 = vor.u32 %v4630_v33, %v3710_v34  ;;  %v4521_v26 = vld [vmem:[#allocation5 + $0x1d4] sm:$0xf0] }
  0x6c   :  { %1648 = vmatpush.bf16.msra.mxu0 %v3361_v5  ;;  %v3438_v40 = vld [vmem:[#allocation5 + $0x330] sm:$0xf0]  ;;  %v4626_v44 = vld [vmem:[#allocation5 + $0x524] sm:$0xf]  ;;  %v3313_v46 = vor.u32 %v4530_v35, %v3310_v38  ;;  %v3124_v28 = vld [vmem:[#allocation5 + $0xa8] sm:$0xf]  ;;  %v3269_v34 = vor.u32 %v4521_v26, %v3268_v25 }
  0x6d   :  { %v3566_v42 = vld [vmem:[#allocation5 + $0x430] sm:$0xf0]  ;;  %v3441_v47 = vor.u32 %v4562_v39, %v3438_v40  ;;  %v4526_v48 = vld [vmem:[#allocation5 + $0x204] sm:$0xf]  ;;  %v4549_v33 = vld [vmem:[#allocation5 + $0x2b4] sm:$0xf0] }
  0x6e   :  { %1686 = vmatpush.bf16.msrb.mxu2 %v3761_v4  ;;  %v3694_v45 = vld [vmem:[#allocation5 + $0x530] sm:$0xf0]  ;;  %v4558_v50 = vld [vmem:[#allocation5 + $0x304] sm:$0xf]  ;;  %v3569_v51 = vor.u32 %v4594_v41, %v3566_v42  ;;  %v3508_v35 = vld [vmem:[#allocation5 + $0x3a8] sm:$0xf] }
  0x6f   :  { %1661 = vmatpush.bf16.msra.mxu1 %v3489_v6  ;;  %1674 = vmatpush.bf16.msra.mxu3 %v3617_v11  ;;  %v3294_v49 = vld [vmem:[#allocation5 + $0x210] sm:$0xf0]  ;;  %v4590_v53 = vld [vmem:[#allocation5 + $0x404] sm:$0xf]  ;;  %v3697_v60 = vor.u32 %v4626_v44, %v3694_v45  ;;  %v3252_v39 = vld [vmem:[#allocation5 + $0x1a8] sm:$0xf] }
  0x70   :  { %1649 = vmatpush.bf16.msra.mxu0 %v3345_v18  ;;  %v3422_v52 = vld [vmem:[#allocation5 + $0x310] sm:$0xf0]  ;;  %v4654_v59 = vld [vmem:[#allocation5 + $0x604] sm:$0xf]  ;;  %v3297_v2 = vor.u32 %v4526_v48, %v3294_v49  ;;  %v3541_v18 = vor.u32 %v4589_v10, %v3540_v9  ;;  %v4517_v40 = vld [vmem:[#allocation5 + $0x1b4] sm:$0xf0] }
  0x71   :  { %v3550_v55 = vld [vmem:[#allocation5 + $0x410] sm:$0xf0]  ;;  %v3425_v3 = vor.u32 %v4558_v50, %v3422_v52  ;;  %v4622_v4 = vld [vmem:[#allocation5 + $0x504] sm:$0xf]  ;;  %v3108_v42 = vld [vmem:[#allocation5 + $0x88] sm:$0xf] }
  0x72   :  { %1687 = vmatpush.bf16.msrb.mxu2 %v3745_v17  ;;  %v3806_v62 = vld [vmem:[#allocation5 + $0x610] sm:$0xf0]  ;;  %v3553_v6 = vor.u32 %v4590_v53, %v3550_v55  ;;  %v4489_v17 = vld [vmem:[#allocation5 + $0xd4] sm:$0xf0]  ;;  %v3364_v45 = vld [vmem:[#allocation5 + $0x288] sm:$0xf] }
  0x73   :  { %1662 = vmatpush.bf16.msra.mxu1 %v3473_v19  ;;  %1675 = vmatpush.bf16.msra.mxu3 %v3601_v23  ;;  %v3678_v5 = vld [vmem:[#allocation5 + $0x510] sm:$0xf0]  ;;  %v3809_v11 = vor.u32 %v4654_v59, %v3806_v62  ;;  %v3396_v19 = vld [vmem:[#allocation5 + $0x2c8] sm:$0xf]  ;;  %v4585_v23 = vld [vmem:[#allocation5 + $0x3d4] sm:$0xf0]  ;;  %v3141_v24 = vor.u32 %v4489_v17, %v3140_v16 }
  0x74   :  { %1650 = vmatpush.bf16.msra.mxu0 %v3329_v30  ;;  %v3681_v15 = vor.u32 %v4622_v4, %v3678_v5  ;;  %v3397_v27 = vor.u32 %v4553_v20, %v3396_v19  ;;  %v3525_v30 = vor.u32 %v4585_v23, %v3524_v22  ;;  %v3492_v48 = vld [vmem:[#allocation5 + $0x388] sm:$0xf]  ;;  %v4577_v49 = vld [vmem:[#allocation5 + $0x394] sm:$0xf0] }
  0x75   :  { %v4513_v52 = vld [vmem:[#allocation5 + $0x194] sm:$0xf0]  ;;  %v3092_v55 = vld [vmem:[#allocation5 + $0x68] sm:$0xf]  ;;  %v3493_v58 = vor.u32 %v4577_v49, %v3492_v48  ;;  %v4491_v48 = vld [vmem:[#allocation5 + $0xec] sm:$0xf] }
  0x76   :  { %1688 = vmatpush.bf16.msrb.mxu2 %v3729_v29  ;;  %v4485_v29 = vld [vmem:[#allocation5 + $0xb4] sm:$0xf0]  ;;  %v3348_v59 = vld [vmem:[#allocation5 + $0x268] sm:$0xf]  ;;  %v3158_v49 = vld [vmem:[#allocation5 + $0xf8] sm:$0xf0] }
  0x77   :  { %1663 = vmatpush.bf16.msra.mxu1 %v3457_v31  ;;  %1676 = vmatpush.bf16.msra.mxu3 %v3585_v36  ;;  %v3380_v31 = vld [vmem:[#allocation5 + $0x2a8] sm:$0xf]  ;;  %v4581_v36 = vld [vmem:[#allocation5 + $0x3b4] sm:$0xf0]  ;;  %v3125_v38 = vor.u32 %v4485_v29, %v3124_v28 }
  0x78   :  { %1651 = vmatpush.bf16.msra.mxu0 %v3313_v46  ;;  %v3381_v41 = vor.u32 %v4549_v33, %v3380_v31  ;;  %v3509_v44 = vor.u32 %v4581_v36, %v3508_v35  ;;  %v4545_v46 = vld [vmem:[#allocation5 + $0x294] sm:$0xf0]  ;;  %v3476_v0 = vld [vmem:[#allocation5 + $0x368] sm:$0xf] }
  0x79   :  { %v3365_v53 = vor.u32 %v4545_v46, %v3364_v45  ;;  %v4477_v57 = vld [vmem:[#allocation5 + $0x74] sm:$0xf0]  ;;  %v3332_v10 = vld [vmem:[#allocation5 + $0x248] sm:$0xf] }
  0x7a   :  { %1689 = vmatpush.bf16.msrb.mxu2 %v3713_v43  ;;  %v4481_v43 = vld [vmem:[#allocation5 + $0x94] sm:$0xf0]  ;;  %v3460_v13 = vld [vmem:[#allocation5 + $0x348] sm:$0xf] }
  0x7b   :  { %1664 = vmatpush.bf16.msra.mxu1 %v3441_v47  ;;  %1677 = vmatpush.bf16.msra.mxu3 %v3569_v51  ;;  %v3253_v47 = vor.u32 %v4517_v40, %v3252_v39  ;;  %v3109_v50 = vor.u32 %v4481_v43, %v3108_v42  ;;  %v3236_v51 = vld [vmem:[#allocation5 + $0x188] sm:$0xf]  ;;  %v4573_v1 = vld [vmem:[#allocation5 + $0x374] sm:$0xf0] }
  0x7c   :  { %1652 = vmatpush.bf16.msra.mxu0 %v3297_v2  ;;  %v3237_v62 = vor.u32 %v4513_v52, %v3236_v51  ;;  %v3093_v2 = vor.u32 %v4477_v57, %v3092_v55  ;;  %v4509_v4 = vld [vmem:[#allocation5 + $0x174] sm:$0xf0]  ;;  %v3477_v9 = vor.u32 %v4573_v1, %v3476_v0  ;;  %v3204_v16 = vld [vmem:[#allocation5 + $0x148] sm:$0xf]  ;;  %v3161_v1 = vor.u32 %v4491_v48, %v3158_v49 }
  0x7d   :  { %v4505_v17 = vld [vmem:[#allocation5 + $0x154] sm:$0xf0]  ;;  %v3060_v19 = vld [vmem:[#allocation5 + $0x28] sm:$0xf] }
  0x7e   :  { %1690 = vmatpush.bf16.msrb.mxu2 %v3697_v60  ;;  %v4541_v60 = vld [vmem:[#allocation5 + $0x274] sm:$0xf0]  ;;  %v3316_v22 = vld [vmem:[#allocation5 + $0x228] sm:$0xf] }
  0x7f   :  { %1665 = vmatpush.bf16.msra.mxu1 %v3425_v3  ;;  %1678 = vmatpush.bf16.msra.mxu3 %v3553_v6  ;;  %v3220_v3 = vld [vmem:[#allocation5 + $0x168] sm:$0xf]  ;;  %v3349_v5 = vor.u32 %v4541_v60, %v3348_v59  ;;  %v4469_v20 = vld [vmem:[#allocation5 + $0x34] sm:$0xf0]  ;;  %v4523_v60 = vld [vmem:[#allocation5 + $0x1ec] sm:$0xf] }
  0x80   :  { %1736 = vmatpush.bf16.msrb.mxu0 %v3413_v14  ;;  %v3076_v6 = vld [vmem:[#allocation5 + $0x48] sm:$0xf]  ;;  %v3221_v12 = vor.u32 %v4509_v4, %v3220_v3  ;;  %v4569_v14 = vld [vmem:[#allocation5 + $0x354] sm:$0xf0]  ;;  %v4487_v3 = vld [vmem:[#allocation5 + $0xcc] sm:$0xf] }
  0x81   :  { %1653 = vmatmul.bf16.vlgmr.msra.gmra.mxu0 %v5077_v54  ;;  %v4533_v23 = vld [vmem:[#allocation5 + $0x234] sm:$0xf0]  ;;  %v3444_v25 = vld [vmem:[#allocation5 + $0x328] sm:$0xf]  ;;  %v3142_v4 = vld [vmem:[#allocation5 + $0xd8] sm:$0xf0] }
  0x82   :  { %1691 = vmatpush.bf16.msrb.mxu2 %v3681_v15  ;;  %1679 = vmatmul.bf16.vlgmr.msra.gmra.mxu3 %v5093_v32  ;;  %v4565_v26 = vld [vmem:[#allocation5 + $0x334] sm:$0xf0]  ;;  %v3188_v28 = vld [vmem:[#allocation5 + $0x128] sm:$0xf]  ;;  %v3317_v31 = vor.u32 %v4533_v23, %v3316_v22 }
  0x83   :  { %1710 = vmatpush.bf16.msrb.mxu1 %v3157_v7  ;;  %1704 = vmatpush.bf16.msrb.mxu3 %v3809_v11  ;;  %v4473_v7 = vld [vmem:[#allocation5 + $0x54] sm:$0xf0]  ;;  %v3445_v36 = vor.u32 %v4565_v26, %v3444_v25  ;;  %v3300_v39 = vld [vmem:[#allocation5 + $0x208] sm:$0xf]  ;;  %v3254_v25 = vld [vmem:[#allocation5 + $0x1b8] sm:$0xf0] }
  0x84   :  { %1666 = vmatmul.bf16.vlgmr.msra.gmra.mxu1 %v5081_v63  ;;  %1737 = vmatpush.bf16.msrb.mxu0 %v3397_v27  ;;  %v4537_v11 = vld [vmem:[#allocation5 + $0x254] sm:$0xf0]  ;;  %v3077_v15 = vor.u32 %v4473_v7, %v3076_v6  ;;  %v3061_v27 = vor.u32 %v4469_v20, %v3060_v19  ;;  %v3796_v52 = vld [vmem:[#allocation5 + $0x5e8] sm:$0xf] }
  0x85   :  { %1692 = vmatmul.bf16.vlgmr.msrb.gmra.mxu2 %v5095_v37  ;;  %v4501_v29 = vld [vmem:[#allocation5 + $0x134] sm:$0xf0]  ;;  %v3652_v55 = vld [vmem:[#allocation5 + $0x4c8] sm:$0xf] }
  0x86   :  { %1749 = vmatpush.bf16.msra.mxu2 %v3541_v18  ;;  %v3333_v18 = vor.u32 %v4537_v11, %v3332_v10  ;;  %v4465_v33 = vld [vmem:[#allocation5 + $0x14] sm:$0xf0]  ;;  %v3189_v42 = vor.u32 %v4501_v29, %v3188_v28  ;;  %v3780_v7 = vld [vmem:[#allocation5 + $0x5c8] sm:$0xf]  ;;  %v4479_v28 = vld [vmem:[#allocation5 + $0x8c] sm:$0xf] }
  0x87   :  { %1723 = vmatpush.bf16.msra.mxu3 %v3285_v21  ;;  %1711 = vmatpush.bf16.msrb.mxu1 %v3141_v24  ;;  %v3461_v21 = vor.u32 %v4569_v14, %v3460_v13  ;;  %v3205_v24 = vor.u32 %v4505_v17, %v3204_v16  ;;  %v4621_v35 = vld [vmem:[#allocation5 + $0x4f4] sm:$0xf0]  ;;  %v3636_v10 = vld [vmem:[#allocation5 + $0x4a8] sm:$0xf]  ;;  %v3270_v13 = vld [vmem:[#allocation5 + $0x1d8] sm:$0xf0]  ;;  %v3145_v14 = vor.u32 %v4487_v3, %v3142_v4 }
  0x88   :  { %1738 = vmatpush.bf16.msrb.mxu0 %v3381_v41  ;;  %v4529_v40 = vld [vmem:[#allocation5 + $0x214] sm:$0xf0]  ;;  %v3428_v41 = vld [vmem:[#allocation5 + $0x308] sm:$0xf]  ;;  %v4483_v16 = vld [vmem:[#allocation5 + $0xac] sm:$0xf] }
  0x89   :  { %v4561_v43 = vld [vmem:[#allocation5 + $0x314] sm:$0xf0]  ;;  %v3301_v51 = vor.u32 %v4529_v40, %v3300_v39  ;;  %v3126_v17 = vld [vmem:[#allocation5 + $0xb8] sm:$0xf0]  ;;  %v3764_v20 = vld [vmem:[#allocation5 + $0x5a8] sm:$0xf] }
  0x8a   :  { %1750 = vmatpush.bf16.msra.mxu2 %v3525_v30  ;;  %v3044_v30 = vld [vmem:[#allocation5 + $0x8] sm:$0xf]  ;;  %v4657_v45 = vld [vmem:[#allocation5 + $0x614] sm:$0xf0]  ;;  %v3429_v57 = vor.u32 %v4561_v43, %v3428_v41  ;;  %v3129_v26 = vor.u32 %v4483_v16, %v3126_v17  ;;  %v3110_v29 = vld [vmem:[#allocation5 + $0x98] sm:$0xf0] }
  0x8b   :  { %1724 = vmatpush.bf16.msra.mxu3 %v3269_v34  ;;  %1712 = vmatpush.bf16.msrb.mxu1 %v3125_v38  ;;  %v3668_v34 = vld [vmem:[#allocation5 + $0x4e8] sm:$0xf]  ;;  %v3045_v46 = vor.u32 %v4465_v33, %v3044_v30  ;;  %v4613_v11 = vld [vmem:[#allocation5 + $0x4b4] sm:$0xf0]  ;;  %v3238_v39 = vld [vmem:[#allocation5 + $0x198] sm:$0xf0]  ;;  %v3113_v40 = vor.u32 %v4479_v28, %v3110_v29 }
  0x8c   :  { %1739 = vmatpush.bf16.msrb.mxu0 %v3365_v53  ;;  %v3172_v38 = vld [vmem:[#allocation5 + $0x108] sm:$0xf]  ;;  %v4653_v53 = vld [vmem:[#allocation5 + $0x5f4] sm:$0xf0]  ;;  %v3094_v43 = vld [vmem:[#allocation5 + $0x78] sm:$0xf0] }
  0x8d   :  { %v3620_v22 = vld [vmem:[#allocation5 + $0x488] sm:$0xf]  ;;  %v4609_v23 = vld [vmem:[#allocation5 + $0x494] sm:$0xf0]  ;;  %v3206_v3 = vld [vmem:[#allocation5 + $0x158] sm:$0xf0] }
  0x8e   :  { %1751 = vmatpush.bf16.msra.mxu2 %v3509_v44  ;;  %v3812_v44 = vld [vmem:[#allocation5 + $0x608] sm:$0xf]  ;;  %v3621_v30 = vor.u32 %v4609_v23, %v3620_v22  ;;  %v4601_v49 = vld [vmem:[#allocation5 + $0x454] sm:$0xf0]  ;;  %v3190_v16 = vld [vmem:[#allocation5 + $0x138] sm:$0xf0] }
  0x8f   :  { %1725 = vmatpush.bf16.msra.mxu3 %v3253_v47  ;;  %1713 = vmatpush.bf16.msrb.mxu1 %v3109_v50  ;;  %v4497_v47 = vld [vmem:[#allocation5 + $0x114] sm:$0xf0]  ;;  %v3669_v50 = vor.u32 %v4621_v35, %v3668_v34  ;;  %v3813_v59 = vor.u32 %v4657_v45, %v3812_v44  ;;  %v3748_v33 = vld [vmem:[#allocation5 + $0x588] sm:$0xf]  ;;  %v4463_v22 = vld [vmem:[#allocation5 + $0xc] sm:$0xf] }
  0x90   :  { %1740 = vmatpush.bf16.msrb.mxu0 %v3349_v5  ;;  %v3173_v0 = vor.u32 %v4497_v47, %v3172_v38  ;;  %v4641_v34 = vld [vmem:[#allocation5 + $0x594] sm:$0xf0]  ;;  %v3604_v35 = vld [vmem:[#allocation5 + $0x468] sm:$0xf]  ;;  %v4511_v38 = vld [vmem:[#allocation5 + $0x18c] sm:$0xf] }
  0x91   :  { %v3749_v41 = vor.u32 %v4641_v34, %v3748_v33  ;;  %v3241_v45 = vor.u32 %v4511_v38, %v3238_v39  ;;  %v4637_v47 = vld [vmem:[#allocation5 + $0x574] sm:$0xf0]  ;;  %v3588_v48 = vld [vmem:[#allocation5 + $0x448] sm:$0xf]  ;;  %v3046_v23 = vld [vmem:[#allocation5 + $0x18] sm:$0xf0] }
  0x92   :  { %1752 = vmatpush.bf16.msra.mxu2 %v3493_v58  ;;  %3819 = vmatmul.msk.bf16.vlgmr.msrb.gmra.mxu3 %vm1524_vm0, %v5089_v61  ;;  %v4617_v58 = vld [vmem:[#allocation5 + $0x4d4] sm:$0xf0]  ;;  %v3542_v28 = vld [vmem:[#allocation5 + $0x3f8] sm:$0xf0]  ;;  %v4551_v33 = vld [vmem:[#allocation5 + $0x2cc] sm:$0xf]  ;;  %v3049_v34 = vor.u32 %v4463_v22, %v3046_v23 }
  0x93   :  { %1726 = vmatpush.bf16.msra.mxu3 %v3237_v62  ;;  %1714 = vmatpush.bf16.msrb.mxu1 %v3093_v2  ;;  %v3286_v62 = vld [vmem:[#allocation5 + $0x1f8] sm:$0xf0]  ;;  %v3797_v2 = vor.u32 %v4653_v53, %v3796_v52  ;;  %v3653_v5 = vor.u32 %v4617_v58, %v3652_v55  ;;  %v4471_v55 = vld [vmem:[#allocation5 + $0x4c] sm:$0xf]  ;;  %v3589_v58 = vor.u32 %v4601_v49, %v3588_v48 }
  0x94   :  { %1741 = vmatpush.bf16.msrb.mxu0 %v3333_v18  ;;  %v3289_v6 = vor.u32 %v4523_v60, %v3286_v62  ;;  %v3637_v18 = vor.u32 %v4613_v11, %v3636_v10  ;;  %v3716_v60 = vld [vmem:[#allocation5 + $0x548] sm:$0xf]  ;;  %v4633_v62 = vld [vmem:[#allocation5 + $0x554] sm:$0xf0]  ;;  %v3174_v38 = vld [vmem:[#allocation5 + $0x118] sm:$0xf0] }
  0x95   :  { %v3700_v11 = vld [vmem:[#allocation5 + $0x528] sm:$0xf]  ;;  %v4615_v48 = vld [vmem:[#allocation5 + $0x4cc] sm:$0xf]  ;;  %v3654_v49 = vld [vmem:[#allocation5 + $0x4d8] sm:$0xf0] }
  0x96   :  { %1753 = vmatpush.bf16.msra.mxu2 %v3477_v9  ;;  %v4649_v9 = vld [vmem:[#allocation5 + $0x5d4] sm:$0xf0]  ;;  %v4571_v22 = vld [vmem:[#allocation5 + $0x36c] sm:$0xf] }
  0x97   :  { %1727 = vmatpush.bf16.msra.mxu3 %v3221_v12  ;;  %1715 = vmatpush.bf16.msrb.mxu1 %v3077_v15  ;;  %v4519_v12 = vld [vmem:[#allocation5 + $0x1cc] sm:$0xf]  ;;  %v3781_v15 = vor.u32 %v4649_v9, %v3780_v7  ;;  %v3062_v7 = vld [vmem:[#allocation5 + $0x38] sm:$0xf0] }
  0x98   :  { %1742 = vmatpush.bf16.msrb.mxu0 %v3317_v31  ;;  %v3273_v19 = vor.u32 %v4519_v12, %v3270_v13  ;;  %v4629_v12 = vld [vmem:[#allocation5 + $0x534] sm:$0xf0]  ;;  %v3556_v13 = vld [vmem:[#allocation5 + $0x408] sm:$0xf] }
  0x9a   :  { %1754 = vmatpush.bf16.msra.mxu2 %v3461_v21  ;;  %v4645_v21 = vld [vmem:[#allocation5 + $0x5b4] sm:$0xf0] }
  0x9b   :  { %1728 = vmatpush.bf16.msra.mxu3 %v3205_v24  ;;  %1716 = vmatpush.bf16.msrb.mxu1 %v3061_v27  ;;  %v4515_v24 = vld [vmem:[#allocation5 + $0x1ac] sm:$0xf]  ;;  %v3765_v27 = vor.u32 %v4645_v21, %v3764_v20  ;;  %v3701_v20 = vor.u32 %v4629_v12, %v3700_v11  ;;  %v3684_v21 = vld [vmem:[#allocation5 + $0x508] sm:$0xf]  ;;  %v3494_v12 = vld [vmem:[#allocation5 + $0x398] sm:$0xf0] }
  0x9c   :  { %1743 = vmatpush.bf16.msrb.mxu0 %v3301_v51  ;;  %v3257_v31 = vor.u32 %v4515_v24, %v3254_v25  ;;  %v3222_v51 = vld [vmem:[#allocation5 + $0x178] sm:$0xf0] }
  0x9e   :  { %1755 = vmatpush.bf16.msra.mxu2 %v3445_v36  ;;  %v4605_v36 = vld [vmem:[#allocation5 + $0x474] sm:$0xf0] }
  0x9f   :  { %1729 = vmatpush.bf16.msra.mxu3 %v3189_v42  ;;  %1717 = vmatpush.bf16.msrb.mxu1 %v3045_v46  ;;  %v4475_v42 = vld [vmem:[#allocation5 + $0x6c] sm:$0xf]  ;;  %v3605_v44 = vor.u32 %v4605_v36, %v3604_v35  ;;  %v3732_v46 = vld [vmem:[#allocation5 + $0x568] sm:$0xf]  ;;  %v3398_v35 = vld [vmem:[#allocation5 + $0x2d8] sm:$0xf0] }
  0xa0   :  { %1795 = vmatpush.bf16.msra.mxu0 %v3813_v59  ;;  %v3097_v52 = vor.u32 %v4475_v42, %v3094_v43  ;;  %v3733_v53 = vor.u32 %v4637_v47, %v3732_v46  ;;  %v4495_v36 = vld [vmem:[#allocation5 + $0x10c] sm:$0xf]  ;;  %v3526_v47 = vld [vmem:[#allocation5 + $0x3d8] sm:$0xf0] }
  0xa1   :  { %1744 = vmatmul.bf16.vlgmr.msrb.gmra.mxu0 %v5077_v54  ;;  %v3177_v46 = vor.u32 %v4495_v36, %v3174_v38  ;;  %v4567_v36 = vld [vmem:[#allocation5 + $0x34c] sm:$0xf] }
  0xa2   :  { %1756 = vmatpush.bf16.msra.mxu2 %v3429_v57  ;;  %1718 = vmatmul.bf16.vlgmr.msrb.gmra.mxu1 %v5079_v56  ;;  %v3078_v57 = vld [vmem:[#allocation5 + $0x58] sm:$0xf0] }
  0xa3   :  { %1762 = vmatpush.bf16.msra.mxu1 %v3669_v50  ;;  %1730 = vmatpush.bf16.msra.mxu3 %v3173_v0  ;;  %v4507_v50 = vld [vmem:[#allocation5 + $0x16c] sm:$0xf]  ;;  %v3572_v0 = vld [vmem:[#allocation5 + $0x428] sm:$0xf]  ;;  %v3081_v4 = vor.u32 %v4471_v55, %v3078_v57  ;;  %v3782_v55 = vld [vmem:[#allocation5 + $0x5d8] sm:$0xf0] }
  0xa4   :  { %1814 = vmatpush.bf16.msrb.mxu0 %v3289_v6  ;;  %v3225_v59 = vor.u32 %v4507_v50, %v3222_v51  ;;  %v4467_v6 = vld [vmem:[#allocation5 + $0x2c] sm:$0xf] }
  0xa5   :  { %1757 = vmatmul.bf16.vlgmr.msra.gmra.mxu2 %v5081_v63  ;;  %v3065_v17 = vor.u32 %v4467_v6, %v3062_v7  ;;  %v4547_v51 = vld [vmem:[#allocation5 + $0x2ac] sm:$0xf]  ;;  %v3766_v6 = vld [vmem:[#allocation5 + $0x5b8] sm:$0xf0] }
  0xa6   :  { %1801 = vmatpush.bf16.msrb.mxu2 %v3161_v1  ;;  %1731 = vmatmul.bf16.vlgmr.msra.gmra.mxu3 %v5085_v8  ;;  %v4597_v1 = vld [vmem:[#allocation5 + $0x434] sm:$0xf0] }
  0xa7   :  { %1775 = vmatpush.bf16.msrb.mxu3 %v3797_v2  ;;  %1763 = vmatpush.bf16.msra.mxu1 %v3653_v5  ;;  %v4503_v2 = vld [vmem:[#allocation5 + $0x14c] sm:$0xf]  ;;  %v3717_v5 = vor.u32 %v4633_v62, %v3716_v60  ;;  %v3573_v9 = vor.u32 %v4597_v1, %v3572_v0  ;;  %v3510_v62 = vld [vmem:[#allocation5 + $0x3b8] sm:$0xf0] }
  0xa8   :  { %1815 = vmatpush.bf16.msrb.mxu0 %v3273_v19  ;;  %v3209_v10 = vor.u32 %v4503_v2, %v3206_v3  ;;  %v3414_v19 = vld [vmem:[#allocation5 + $0x2f8] sm:$0xf0]  ;;  %v4611_v0 = vld [vmem:[#allocation5 + $0x4ac] sm:$0xf] }
  0xa9   :  { %v3638_v1 = vld [vmem:[#allocation5 + $0x4b8] sm:$0xf0]  ;;  %v4543_v3 = vld [vmem:[#allocation5 + $0x28c] sm:$0xf] }
  0xaa   :  { %1802 = vmatpush.bf16.msrb.mxu2 %v3145_v14  ;;  %v4593_v14 = vld [vmem:[#allocation5 + $0x414] sm:$0xf0] }
  0xab   :  { %1776 = vmatpush.bf16.msrb.mxu3 %v3781_v15  ;;  %1764 = vmatpush.bf16.msra.mxu1 %v3637_v18  ;;  %v4499_v15 = vld [vmem:[#allocation5 + $0x12c] sm:$0xf]  ;;  %v3557_v24 = vor.u32 %v4593_v14, %v3556_v13  ;;  %v3622_v14 = vld [vmem:[#allocation5 + $0x498] sm:$0xf0] }
  0xac   :  { %1816 = vmatpush.bf16.msrb.mxu0 %v3257_v31  ;;  %v4555_v18 = vld [vmem:[#allocation5 + $0x2ec] sm:$0xf]  ;;  %v3193_v25 = vor.u32 %v4499_v15, %v3190_v16  ;;  %v3670_v31 = vld [vmem:[#allocation5 + $0x4f8] sm:$0xf0] }
  0xad   :  { %v3417_v29 = vor.u32 %v4555_v18, %v3414_v19  ;;  %v4607_v13 = vld [vmem:[#allocation5 + $0x48c] sm:$0xf]  ;;  %v3750_v19 = vld [vmem:[#allocation5 + $0x598] sm:$0xf0] }
  0xae   :  { %1803 = vmatpush.bf16.msrb.mxu2 %v3129_v26  ;;  %v4625_v26 = vld [vmem:[#allocation5 + $0x514] sm:$0xf0]  ;;  %v4539_v16 = vld [vmem:[#allocation5 + $0x26c] sm:$0xf] }
  0xaf   :  { %1777 = vmatpush.bf16.msrb.mxu3 %v3765_v27  ;;  %1765 = vmatpush.bf16.msra.mxu1 %v3621_v30  ;;  %v4587_v27 = vld [vmem:[#allocation5 + $0x3ec] sm:$0xf]  ;;  %v3685_v39 = vor.u32 %v4625_v26, %v3684_v21  ;;  %v3625_v21 = vor.u32 %v4607_v13, %v3622_v14  ;;  %v3606_v26 = vld [vmem:[#allocation5 + $0x478] sm:$0xf0] }
  0xb0   :  { %1817 = vmatpush.bf16.msrb.mxu0 %v3241_v45  ;;  %v4619_v30 = vld [vmem:[#allocation5 + $0x4ec] sm:$0xf]  ;;  %v3545_v42 = vor.u32 %v4587_v27, %v3542_v28  ;;  %v3401_v45 = vor.u32 %v4551_v33, %v3398_v35  ;;  %v3558_v13 = vld [vmem:[#allocation5 + $0x418] sm:$0xf0] }
  0xb1   :  { %3820 = vmatmul.msk.bf16.vlgmr.msra.gmra.mxu0 %vm1524_vm0, %v5089_v61  ;;  %v3673_v43 = vor.u32 %v4619_v30, %v3670_v31  ;;  %v4535_v28 = vld [vmem:[#allocation5 + $0x24c] sm:$0xf]  ;;  %v3734_v31 = vld [vmem:[#allocation5 + $0x578] sm:$0xf0] }
  0xb2   :  { %1804 = vmatpush.bf16.msrb.mxu2 %v3113_v40  ;;  %v4651_v40 = vld [vmem:[#allocation5 + $0x5ec] sm:$0xf] }
  0xb3   :  { %1778 = vmatpush.bf16.msrb.mxu3 %v3749_v41  ;;  %1766 = vmatpush.bf16.msra.mxu1 %v3605_v44  ;;  %v3798_v41 = vld [vmem:[#allocation5 + $0x5f8] sm:$0xf0]  ;;  %v4583_v44 = vld [vmem:[#allocation5 + $0x3cc] sm:$0xf] }
  0xb4   :  { %1818 = vmatpush.bf16.msrb.mxu0 %v3225_v59  ;;  %v3801_v50 = vor.u32 %v4651_v40, %v3798_v41  ;;  %v3529_v57 = vor.u32 %v4583_v44, %v3526_v47  ;;  %v4579_v59 = vld [vmem:[#allocation5 + $0x3ac] sm:$0xf]  ;;  %v3462_v40 = vld [vmem:[#allocation5 + $0x358] sm:$0xf0] }
  0xb5   :  { %v3513_v7 = vor.u32 %v4579_v59, %v3510_v62  ;;  %v4635_v30 = vld [vmem:[#allocation5 + $0x56c] sm:$0xf] }
  0xb6   :  { %1805 = vmatpush.bf16.msrb.mxu2 %v3097_v52  ;;  %v3382_v52 = vld [vmem:[#allocation5 + $0x2b8] sm:$0xf0]  ;;  %v4599_v41 = vld [vmem:[#allocation5 + $0x44c] sm:$0xf] }
  0xb7   :  { %1779 = vmatpush.bf16.msrb.mxu3 %v3733_v53  ;;  %1767 = vmatpush.bf16.msra.mxu1 %v3589_v58  ;;  %v4647_v53 = vld [vmem:[#allocation5 + $0x5cc] sm:$0xf]  ;;  %v3657_v58 = vor.u32 %v4615_v48, %v3654_v49  ;;  %v3385_v60 = vor.u32 %v4547_v51, %v3382_v52  ;;  %v3718_v48 = vld [vmem:[#allocation5 + $0x558] sm:$0xf0]  ;;  %v3465_v49 = vor.u32 %v4567_v36, %v3462_v40  ;;  %v4680_v40 = vld [vmem:[#allocation8 + $0xac] sm:$0xf0] }
  0xb8   :  { %1819 = vmatpush.bf16.msrb.mxu0 %v3209_v10  ;;  %v3785_v2 = vor.u32 %v4647_v53, %v3782_v55  ;;  %v4575_v10 = vld [vmem:[#allocation5 + $0x38c] sm:$0xf]  ;;  %v3446_v53 = vld [vmem:[#allocation5 + $0x338] sm:$0xf0] }
  0xb9   :  { %v4531_v44 = vld [vmem:[#allocation5 + $0x22c] sm:$0xf] }
  0xba   :  { %1806 = vmatpush.bf16.msrb.mxu2 %v3081_v4  ;;  %v3366_v4 = vld [vmem:[#allocation5 + $0x298] sm:$0xf0]  ;;  %v4631_v47 = vld [vmem:[#allocation5 + $0x54c] sm:$0xf] }
  0xbb   :  { %1780 = vmatpush.bf16.msrb.mxu3 %v3717_v5  ;;  %1768 = vmatpush.bf16.msra.mxu1 %v3573_v9  ;;  %v4643_v5 = vld [vmem:[#allocation5 + $0x5ac] sm:$0xf]  ;;  %v3641_v9 = vor.u32 %v4611_v0, %v3638_v1  ;;  %v3369_v11 = vor.u32 %v4543_v3, %v3366_v4  ;;  %v3702_v1 = vld [vmem:[#allocation5 + $0x538] sm:$0xf0]  ;;  %v5125_v4 = vld [vmem:[#allocation7] sm:$0xf] }
  0xbc   :  { %1820 = vmatpush.bf16.msrb.mxu0 %v3193_v25  ;;  %v3769_v15 = vor.u32 %v4643_v5, %v3766_v6  ;;  %v4603_v25 = vld [vmem:[#allocation5 + $0x46c] sm:$0xf]  ;;  %v3814_v3 = vld [vmem:[#allocation5 + $0x618] sm:$0xf0] }
  0xbd   :  { %v3609_v35 = vor.u32 %v4603_v25, %v3606_v26  ;;  %v4563_v51 = vld [vmem:[#allocation5 + $0x32c] sm:$0xf] }
  0xbe   :  { %1807 = vmatpush.bf16.msrb.mxu2 %v3065_v17  ;;  %v3350_v17 = vld [vmem:[#allocation5 + $0x278] sm:$0xf0]  ;;  %v4595_v55 = vld [vmem:[#allocation5 + $0x42c] sm:$0xf]  ;;  %v3449_v6 = vor.u32 %v4563_v51, %v3446_v53  ;;  %v4672_v53 = vld [vmem:[#allocation8 + $0x6c] sm:$0xf0] }
  0xbf   :  { %1781 = vmatpush.bf16.msrb.mxu3 %v3701_v20  ;;  %1769 = vmatpush.bf16.msra.mxu1 %v3557_v24  ;;  %v3497_v20 = vor.u32 %v4575_v10, %v3494_v12  ;;  %v3353_v23 = vor.u32 %v4539_v16, %v3350_v17  ;;  %v3478_v24 = vld [vmem:[#allocation5 + $0x378] sm:$0xf0]  ;;  %v4527_v59 = vld [vmem:[#allocation5 + $0x20c] sm:$0xf]  ;;  %v3936_v16 = vld [vmem:[#allocation8 + $0xe0] sm:$0xf] }
  0xc0   :  { %1821 = vmatpush.bf16.msrb.mxu0 %v3177_v46  ;;  %v4627_v62 = vld [vmem:[#allocation5 + $0x52c] sm:$0xf]  ;;  %v4688_v17 = vld [vmem:[#allocation8 + $0xec] sm:$0xf0] }
  0xc1   :  { %v4591_v12 = vld [vmem:[#allocation5 + $0x40c] sm:$0xf]  ;;  %v3937_v26 = vor.u32 %v4688_v17, %v3936_v16  ;;  %v4660_v16 = vld [vmem:[#allocation8 + $0xc] sm:$0xf0] }
  0xc2   :  { %1808 = vmatpush.bf16.msrb.mxu2 %v3049_v34  ;;  %1770 = vmatmul.bf16.vlgmr.msra.gmra.mxu1 %v5093_v32  ;;  %v5117_v18 = vpop.f32.mrf.mxu0  ;;  %v3481_v34 = vor.u32 %v4571_v22, %v3478_v24  ;;  %v4720_v22 = vld [vmem:[#allocation8 + $0x1ec] sm:$0xf0]  ;;  %v3561_v25 = vor.u32 %v4591_v12, %v3558_v13  ;;  %v3968_v12 = vld [vmem:[#allocation8 + $0x120] sm:$0xf] }
  0xc3   :  { %1827 = vmatpush.bf16.msrb.mxu1 %v3417_v29  ;;  %1782 = vmatpush.bf16.msrb.mxu3 %v3685_v39  ;;  %v3334_v29 = vld [vmem:[#allocation5 + $0x258] sm:$0xf0]  ;;  %v4696_v13 = vld [vmem:[#allocation8 + $0x12c] sm:$0xf0] }
  0xc4   :  { %1866 = vmatpush.bf16.msra.mxu0 %v3801_v50  ;;  %v3337_v38 = vor.u32 %v4535_v28, %v3334_v29  ;;  %v3920_v28 = vld [vmem:[#allocation8 + $0xc0] sm:$0xf]  ;;  %v4684_v29 = vld [vmem:[#allocation8 + $0xcc] sm:$0xf0] }
  0xc5   :  { %1809 = vmatmul.bf16.vlgmr.msrb.gmra.mxu2 %v5079_v56  ;;  %1822 = vmatmul.bf16.vlgmr.msrb.gmra.mxu0 %v5085_v8  ;;  %v4639_v56 = vld [vmem:[#allocation5 + $0x58c] sm:$0xf]  ;;  %v5119_v27 = vpop.f32.mrf.mxu1  ;;  %v3921_v36 = vor.u32 %v4684_v29, %v3920_v28  ;;  %v4066_v28 = vld [vmem:[#allocation8 + $0x1f0] sm:$0xf0] }
  0xc6   :  { %1853 = vmatpush.bf16.msra.mxu2 %v3673_v43  ;;  %1783 = vmatmul.bf16.vlgmr.msrb.gmra.mxu3 %v5095_v37  ;;  %v3753_v8 = vor.u32 %v4639_v56, %v3750_v19  ;;  %v3737_v43 = vor.u32 %v4635_v30, %v3734_v31  ;;  %v4623_v56 = vld [vmem:[#allocation5 + $0x50c] sm:$0xf]  ;;  %v4048_v31 = vld [vmem:[#allocation8 + $0x1c0] sm:$0xf] }
  0xc7   :  { %1840 = vmatpush.bf16.msra.mxu3 %v3545_v42  ;;  %1828 = vmatpush.bf16.msrb.mxu1 %v3401_v45  ;;  %v3590_v42 = vld [vmem:[#allocation5 + $0x458] sm:$0xf0] }
  0xc8   :  { %1867 = vmatpush.bf16.msra.mxu0 %v3785_v2  ;;  %v5121_v33 = vpop.f32.mrf.mxu2  ;;  %v3318_v45 = vld [vmem:[#allocation5 + $0x238] sm:$0xf0]  ;;  %v3593_v50 = vor.u32 %v4599_v41, %v3590_v42  ;;  %v4655_v2 = vld [vmem:[#allocation5 + $0x60c] sm:$0xf]  ;;  %v4032_v42 = vld [vmem:[#allocation8 + $0x1a0] sm:$0xf] }
  0xc9   :  { %v5123_v39 = vpop.f32.mrf.mxu3  ;;  %v3321_v52 = vor.u32 %v4531_v44, %v3318_v45  ;;  %v3817_v19 = vor.u32 %v4655_v2, %v3814_v3  ;;  %v3888_v45 = vld [vmem:[#allocation8 + $0x80] sm:$0xf]  ;;  %v4700_v3 = vld [vmem:[#allocation8 + $0x14c] sm:$0xf0] }
  0xca   :  { %1854 = vmatpush.bf16.msra.mxu2 %v3657_v58  ;;  %v1539_v46 = vpop.f32.mrf.mxu0  ;;  %v3721_v58 = vor.u32 %v4631_v47, %v3718_v48  ;;  %v3984_v2 = vld [vmem:[#allocation8 + $0x140] sm:$0xf] }
  0xcb   :  { %1841 = vmatpush.bf16.msra.mxu3 %v3529_v57  ;;  %1829 = vmatpush.bf16.msrb.mxu1 %v3385_v60  ;;  %v3574_v57 = vld [vmem:[#allocation5 + $0x438] sm:$0xf0]  ;;  %v4676_v46 = vld [vmem:[#allocation8 + $0x8c] sm:$0xf0] }
  0xcc   :  { %1868 = vmatpush.bf16.msra.mxu0 %v3769_v15  ;;  %v3302_v60 = vld [vmem:[#allocation5 + $0x218] sm:$0xf0]  ;;  %v3705_v15 = vor.u32 %v4627_v62, %v3702_v1  ;;  %v3856_v62 = vld [vmem:[#allocation8 + $0x40] sm:$0xf] }
  0xcd   :  { %v1552_v0 = vpop.f32.mrf.mxu1  ;;  %v3305_v10 = vor.u32 %v4527_v59, %v3302_v60 }
  0xce   :  { %1855 = vmatpush.bf16.msra.mxu2 %v3641_v9  ;;  %v4559_v9 = vld [vmem:[#allocation5 + $0x30c] sm:$0xf]  ;;  %v4668_v0 = vld [vmem:[#allocation8 + $0x4c] sm:$0xf0] }
  0xcf   :  { %1842 = vmatpush.bf16.msra.mxu3 %v3513_v7  ;;  %1830 = vmatpush.bf16.msrb.mxu1 %v3369_v11  ;;  %v3577_v7 = vor.u32 %v4595_v55, %v3574_v57  ;;  %v3430_v11 = vld [vmem:[#allocation5 + $0x318] sm:$0xf0]  ;;  %v4000_v55 = vld [vmem:[#allocation8 + $0x160] sm:$0xf]  ;;  %v4704_v57 = vld [vmem:[#allocation8 + $0x16c] sm:$0xf0] }
  0xd0   :  { %1869 = vmatpush.bf16.msra.mxu0 %v3753_v8  ;;  %v1565_v5 = vpop.f32.mrf.mxu2  ;;  %v3433_v24 = vor.u32 %v4559_v9, %v3430_v11  ;;  %v4001_v1 = vor.u32 %v4704_v57, %v4000_v55  ;;  %v3840_v9 = vld [vmem:[#allocation8 + $0x20] sm:$0xf]  ;;  %v3985_v11 = vor.u32 %v4700_v3, %v3984_v2  ;;  %v4674_v55 = vld [vmem:[#allocation8 + $0x84] sm:$0xf]  ;;  %v3890_v57 = vld [vmem:[#allocation8 + $0x90] sm:$0xf0] }
  0xd1   :  { %v1578_v14 = vpop.f32.mrf.mxu3  ;;  %v4736_v2 = vld [vmem:[#allocation8 + $0x26c] sm:$0xf0]  ;;  %v537_v3 = vperm.slane %v5125_v4, 1 }
  0xd2   :  { %1856 = vmatpush.bf16.msra.mxu2 %v3625_v21  ;;  %v4064_v21 = vld [vmem:[#allocation8 + $0x1e0] sm:$0xf] }
  0xd3   :  { %1843 = vmatpush.bf16.msra.mxu3 %v3497_v20  ;;  %1831 = vmatpush.bf16.msrb.mxu1 %v3353_v23  ;;  %v3686_v20 = vld [vmem:[#allocation5 + $0x518] sm:$0xf0]  ;;  %v536_v23 = vperm.slane %v5125_v4, 0  ;;  %v4065_v30 = vor.u32 %v4720_v22, %v4064_v21  ;;  %v4752_v21 = vld [vmem:[#allocation8 + $0x2ec] sm:$0xf0] }
  0xd4   :  { %1870 = vmatpush.bf16.msra.mxu0 %v3737_v43  ;;  %v3689_v8 = vor.u32 %v4623_v56, %v3686_v20  ;;  %v4712_v43 = vld [vmem:[#allocation8 + $0x1ac] sm:$0xf0]  ;;  %v4192_v20 = vld [vmem:[#allocation8 + $0x2e0] sm:$0xf] }
  0xd5   :  { %v4033_v47 = vor.u32 %v4712_v43, %v4032_v42  ;;  %v4714_v43 = vld [vmem:[#allocation8 + $0x1c4] sm:$0xf] }
  0xd6   :  { %1857 = vmatpush.bf16.msra.mxu2 %v3609_v35  ;;  %v1538_v35 = vadd.f32 %v5117_v18, %v536_v23  ;;  %v3938_v23 = vld [vmem:[#allocation8 + $0xf0] sm:$0xf0] }
  0xd7   :  { %1844 = vmatpush.bf16.msra.mxu3 %v3481_v34  ;;  %1832 = vmatpush.bf16.msrb.mxu1 %v3337_v38  ;;  %v4716_v34 = vld [vmem:[#allocation8 + $0x1cc] sm:$0xf0]  ;;  %v3904_v38 = vld [vmem:[#allocation8 + $0xa0] sm:$0xf] }
  0xd8   :  { %1871 = vmatpush.bf16.msra.mxu0 %v3721_v58  ;;  %v4049_v41 = vor.u32 %v4716_v34, %v4048_v31  ;;  %v1551_v44 = vadd.f32 %v5119_v27, %v1538_v35  ;;  %v1615_v18 = vpop.f32.mrf.mxu2  ;;  %v3872_v27 = vld [vmem:[#allocation8 + $0x60] sm:$0xf] }
  0xd9   :  { %v3873_v59 = vor.u32 %v4672_v53, %v3872_v27  ;;  %v4176_v35 = vld [vmem:[#allocation8 + $0x2c0] sm:$0xf] }
  0xda   :  { %1858 = vmatpush.bf16.msra.mxu2 %v3593_v50  ;;  %v4708_v50 = vld [vmem:[#allocation8 + $0x18c] sm:$0xf0]  ;;  %v4144_v53 = vld [vmem:[#allocation8 + $0x280] sm:$0xf] }
  0xdb   :  { %1845 = vmatpush.bf16.msra.mxu3 %v3465_v49  ;;  %1833 = vmatpush.bf16.msrb.mxu1 %v3321_v52  ;;  %v4016_v49 = vld [vmem:[#allocation8 + $0x180] sm:$0xf]  ;;  %v3889_v52 = vor.u32 %v4676_v46, %v3888_v45 }
  0xdc   :  { %1872 = vmatpush.bf16.msra.mxu0 %v3705_v15  ;;  %v3824_v15 = vld [vmem:[#allocation8] sm:$0xf] }
  0xdd   :  { %v3825_v29 = vor.u32 %v4660_v16, %v3824_v15  ;;  %v4160_v46 = vld [vmem:[#allocation8 + $0x2a0] sm:$0xf]  ;;  %v4666_v16 = vld [vmem:[#allocation8 + $0x44] sm:$0xf] }
  0xde   :  { %1859 = vmatpush.bf16.msra.mxu2 %v3577_v7  ;;  %v1589_v48 = vpop.f32.mrf.mxu0  ;;  %v3857_v7 = vor.u32 %v4668_v0, %v3856_v62  ;;  %v3893_v0 = vor.u32 %v4674_v55, %v3890_v57  ;;  %v3928_v57 = vld [vmem:[#allocation8 + $0xc8] sm:$0xf] }
  0xdf   :  { %1846 = vmatpush.bf16.msra.mxu3 %v3449_v6  ;;  %1834 = vmatpush.bf16.msrb.mxu1 %v3305_v10  ;;  %v1602_v51 = vpop.f32.mrf.mxu1  ;;  %v4664_v10 = vld [vmem:[#allocation8 + $0x2c] sm:$0xf0] }
  0xe0   :  { %1873 = vmatpush.bf16.msra.mxu0 %v3689_v8  ;;  %v1617_v58 = vpop.f32.mrf.mxu2  ;;  %v3841_v14 = vor.u32 %v4664_v10, %v3840_v9  ;;  %v4718_v8 = vld [vmem:[#allocation8 + $0x1e4] sm:$0xf] }
  0xe1   :  { %v4702_v10 = vld [vmem:[#allocation8 + $0x164] sm:$0xf] }
  0xe2   :  { %1835 = vmatmul.bf16.vlgmr.msrb.gmra.mxu1 %v5077_v54  ;;  %1860 = vmatpush.bf16.msra.mxu2 %v3561_v25  ;;  %v3905_v54 = vor.u32 %v4680_v40, %v3904_v38  ;;  %v4692_v25 = vld [vmem:[#allocation8 + $0x10c] sm:$0xf0]  ;;  %v4682_v38 = vld [vmem:[#allocation8 + $0xc4] sm:$0xf]  ;;  %v3922_v40 = vld [vmem:[#allocation8 + $0xd0] sm:$0xf0] }
  0xe3   :  { %1886 = vmatpush.bf16.msra.mxu1 %v3817_v19  ;;  %1847 = vmatpush.bf16.msra.mxu3 %v3433_v24  ;;  %v4686_v19 = vld [vmem:[#allocation8 + $0xe4] sm:$0xf]  ;;  %v3952_v24 = vld [vmem:[#allocation8 + $0x100] sm:$0xf]  ;;  %v3925_v45 = vor.u32 %v4682_v38, %v3922_v40 }
  0xe4   :  { %1874 = vmatmul.bf16.vlgmr.msra.gmra.mxu0 %v5095_v37  ;;  %v3941_v31 = vor.u32 %v4686_v19, %v3938_v23  ;;  %v3953_v34 = vor.u32 %v4692_v25, %v3952_v24  ;;  %v4658_v40 = vld [vmem:[#allocation8 + $0x4] sm:$0xf] }
  0xe5   :  { %1861 = vmatmul.bf16.vlgmr.msra.gmra.mxu2 %v5093_v32  ;;  %v4017_v32 = vor.u32 %v4708_v50, %v4016_v49  ;;  %v3906_v49 = vld [vmem:[#allocation8 + $0xb0] sm:$0xf0] }
  0xe6   :  { %1848 = vmatmul.bf16.vlgmr.msra.gmra.mxu3 %v5081_v63  ;;  %v1564_v63 = vadd.f32 %v5121_v33, %v1551_v44  ;;  %v1591_v5 = vpop.f32.mrf.mxu0  ;;  %v4050_v44 = vld [vmem:[#allocation8 + $0x1d0] sm:$0xf0] }
  0xe7   :  { %2549 = vmatpush.bf16.msrb.mxu3 %v3937_v26  ;;  %2562 = vmatpush.bf16.msrb.mxu1 %v4065_v30  ;;  %v5136_v33 = vpop.f32.mrf.mxu3  ;;  %v1604_v6 = vpop.f32.mrf.mxu1  ;;  %v4193_v26 = vor.u32 %v4752_v21, %v4192_v20  ;;  %v4053_v50 = vor.u32 %v4714_v43, %v4050_v44  ;;  %v4698_v21 = vld [vmem:[#allocation8 + $0x144] sm:$0xf]  ;;  %v4080_v43 = vld [vmem:[#allocation8 + $0x200] sm:$0xf]  ;;  %v4724_v44 = vld [vmem:[#allocation8 + $0x20c] sm:$0xf0] }
  0xe8   :  { %v1577_v37 = vadd.f32 %v5123_v39, %v1564_v63  ;;  %v5140_v17 = vpop.f32.mrf.mxu2  ;;  %v4670_v6 = vld [vmem:[#allocation8 + $0x64] sm:$0xf]  ;;  %v1629_v15 = vadd.f32 %v5136_v33, %v537_v3 }
  0xe9   :  { %2575 = vmatpush.bf16.msrb.mxu2 %v4193_v26  ;;  %v4096_v26 = vld [vmem:[#allocation8 + $0x220] sm:$0xf] }
  0xea   :  { %v1590_v60 = vadd.f32 %v1589_v48, %v1577_v37  ;;  %v4678_v48 = vld [vmem:[#allocation8 + $0xa4] sm:$0xf] }
  0xeb   :  { %2550 = vmatpush.bf16.msrb.mxu3 %v3921_v36  ;;  %2563 = vmatpush.bf16.msrb.mxu1 %v4049_v41  ;;  %v4748_v36 = vld [vmem:[#allocation8 + $0x2cc] sm:$0xf0]  ;;  %v4069_v41 = vor.u32 %v4718_v8, %v4066_v28  ;;  %v3909_v27 = vor.u32 %v4678_v48, %v3906_v49  ;;  %v1642_v28 = vadd.f32 %v5140_v17, %v1629_v15  ;;  %v4689_v49 = vld [vmem:[#allocation8 + $0xf4] sm:$0xf0]  ;;  %v4072_v15 = vld [vmem:[#allocation8 + $0x1e8] sm:$0xf] }
  0xec   :  { %v1603_v39 = vadd.f32 %v1602_v51, %v1590_v60  ;;  %v4177_v42 = vor.u32 %v4748_v36, %v4176_v35  ;;  %v4710_v51 = vld [vmem:[#allocation8 + $0x1a4] sm:$0xf]  ;;  %v4018_v60 = vld [vmem:[#allocation8 + $0x190] sm:$0xf0]  ;;  %v4728_v8 = vld [vmem:[#allocation8 + $0x22c] sm:$0xf0]  ;;  %v4081_v17 = vor.u32 %v4724_v44, %v4080_v43 }
  0xed   :  { %v4694_v35 = vld [vmem:[#allocation8 + $0x124] sm:$0xf]  ;;  %v3970_v36 = vld [vmem:[#allocation8 + $0x130] sm:$0xf0]  ;;  %v4272_v44 = vld [vmem:[#allocation8 + $0x380] sm:$0xf] }
  0xee   :  { %v1616_v56 = vadd.f32 %v1615_v18, %v1603_v39  ;;  %2576 = vmatpush.bf16.msrb.mxu2 %v4177_v42  ;;  %v3826_v42 = vld [vmem:[#allocation8 + $0x10] sm:$0xf0] }
  0xef   :  { %2551 = vmatpush.bf16.msrb.mxu3 %v3905_v54  ;;  %2564 = vmatpush.bf16.msrb.mxu1 %v4033_v47  ;;  %v1630_v22 = vpop.f32.mrf.mxu3  ;;  %v4744_v47 = vld [vmem:[#allocation8 + $0x2ac] sm:$0xf0] }
  0xf0   :  { %v1892_v30 = vmax.f32 %v1616_v56, 0.0  ;;  %v1643_v18 = vpop.f32.mrf.mxu2  ;;  %v4161_v63 = vor.u32 %v4744_v47, %v4160_v46  ;;  %v3858_v56 = vld [vmem:[#allocation8 + $0x50] sm:$0xf0]  ;;  %v4750_v46 = vld [vmem:[#allocation8 + $0x2e4] sm:$0xf] }
  0xf1   :  { %v3986_v22 = vld [vmem:[#allocation8 + $0x150] sm:$0xf0]  ;;  %v3861_v25 = vor.u32 %v4666_v16, %v3858_v56  ;;  %v3944_v18 = vld [vmem:[#allocation8 + $0xe8] sm:$0xf]  ;;  %v4721_v16 = vld [vmem:[#allocation8 + $0x1f4] sm:$0xf0] }
  0xf2   :  { %3821 = vmatmul.msk.bf16.vlgmr.msra.gmra.mxu1 %vm1524_vm0, %v5089_v61  ;;  %v3969_v61 = vor.u32 %v4696_v13, %v3968_v12  ;;  %v5142_v54 = vpack.c.bf16 %v1892_v30, %v1892_v30  ;;  %2577 = vmatpush.bf16.msrb.mxu2 %v4161_v63  ;;  %v4112_v13 = vld [vmem:[#allocation8 + $0x240] sm:$0xf]  ;;  %v3842_v30 = vld [vmem:[#allocation8 + $0x30] sm:$0xf0]  ;;  %v3989_v33 = vor.u32 %v4698_v21, %v3986_v22  ;;  %v4677_v21 = vld [vmem:[#allocation8 + $0x94] sm:$0xf0] }
  0xf3   :  { %2552 = vmatpush.bf16.msrb.mxu3 %v3889_v52  ;;  %2565 = vmatpush.bf16.msrb.mxu1 %v4017_v32  ;;  %v4034_v52 = vld [vmem:[#allocation8 + $0x1b0] sm:$0xf0]  ;;  %v4740_v32 = vld [vmem:[#allocation8 + $0x28c] sm:$0xf0]  ;;  %v3945_v55 = vor.u32 %v4689_v49, %v3944_v18  ;;  %v4738_v22 = vld [vmem:[#allocation8 + $0x284] sm:$0xf] }
  0xf4   :  { %v4037_v37 = vor.u32 %v4710_v51, %v4034_v52  ;;  %v4145_v58 = vor.u32 %v4740_v32, %v4144_v53  ;;  %v4194_v47 = vld [vmem:[#allocation8 + $0x2f0] sm:$0xf0]  ;;  %v4772_v18 = vld [vmem:[#allocation8 + $0x38c] sm:$0xf0]  ;;  %v3864_v49 = vld [vmem:[#allocation8 + $0x48] sm:$0xf] }
  0xf5   :  { %v3954_v63 = vld [vmem:[#allocation8 + $0x110] sm:$0xf0]  ;;  %v4197_v51 = vor.u32 %v4750_v46, %v4194_v47  ;;  %v4273_v46 = vor.u32 %v4772_v18, %v4272_v44  ;;  %v4782_v44 = vld [vmem:[#allocation8 + $0x3e4] sm:$0xf] }
  0xf6   :  { %2578 = vmatpush.bf16.msrb.mxu2 %v4145_v58  ;;  %v4746_v58 = vld [vmem:[#allocation8 + $0x2c4] sm:$0xf]  ;;  %v4322_v18 = vld [vmem:[#allocation8 + $0x3f0] sm:$0xf0] }
  0xf7   :  { %2553 = vmatpush.bf16.msrb.mxu3 %v3873_v59  ;;  %2566 = vmatpush.bf16.msrb.mxu1 %v4001_v1  ;;  %v4706_v59 = vld [vmem:[#allocation8 + $0x184] sm:$0xf]  ;;  %v4128_v1 = vld [vmem:[#allocation8 + $0x260] sm:$0xf] }
  0xf8   :  { %v4021_v39 = vor.u32 %v4706_v59, %v4018_v60  ;;  %v4129_v9 = vor.u32 %v4736_v2, %v4128_v1  ;;  %v4178_v59 = vld [vmem:[#allocation8 + $0x2d0] sm:$0xf0]  ;;  %v4685_v60 = vld [vmem:[#allocation8 + $0xd4] sm:$0xf0]  ;;  %v4784_v1 = vld [vmem:[#allocation8 + $0x3ec] sm:$0xf0] }
  0xfa   :  { %2579 = vmatpush.bf16.msrb.mxu2 %v4129_v9 }
  0xfb   :  { %2554 = vmatpush.bf16.msrb.mxu3 %v3857_v7  ;;  %2567 = vmatpush.bf16.msrb.mxu1 %v3985_v11  ;;  %v3874_v7 = vld [vmem:[#allocation8 + $0x70] sm:$0xf0] }
  0xfc   :  { %v4002_v11 = vld [vmem:[#allocation8 + $0x170] sm:$0xf0]  ;;  %v3877_v12 = vor.u32 %v4670_v6, %v3874_v7  ;;  %v3912_v6 = vld [vmem:[#allocation8 + $0xa8] sm:$0xf]  ;;  %v4742_v7 = vld [vmem:[#allocation8 + $0x2a4] sm:$0xf] }
  0xfd   :  { %v4005_v19 = vor.u32 %v4702_v10, %v4002_v11  ;;  %v4681_v10 = vld [vmem:[#allocation8 + $0xb4] sm:$0xf0] }
  0xfe   :  { %v1654_v62 = vpop.f32.mrf.mxu0 }
  0xff   :  { %2555 = vmatpush.bf16.msrb.mxu3 %v3841_v14  ;;  %2568 = vmatpush.bf16.msrb.mxu1 %v3969_v61  ;;  %v4732_v14 = vld [vmem:[#allocation8 + $0x24c] sm:$0xf0]  ;;  %v1655_v38 = vadd.f32 %v1654_v62, %v1642_v28  ;;  %v4181_v62 = vor.u32 %v4746_v58, %v4178_v59  ;;  %v4056_v28 = vld [vmem:[#allocation8 + $0x1c8] sm:$0xf] }
 0x100   :  { %v4113_v61 = vor.u32 %v4732_v14, %v4112_v13  ;;  %v4780_v13 = vld [vmem:[#allocation8 + $0x3cc] sm:$0xf0]  ;;  %v3848_v59 = vld [vmem:[#allocation8 + $0x28] sm:$0xf] }
 0x101   :  { %v1667_v5 = vpop.f32.mrf.mxu1 }
 0x102   :  { %2580 = vmatpush.bf16.msrb.mxu2 %v4113_v61  ;;  %v1668_v52 = vadd.f32 %v1667_v5, %v1655_v38  ;;  %v3929_v5 = vor.u32 %v4685_v60, %v3928_v57  ;;  %v4709_v57 = vld [vmem:[#allocation8 + $0x194] sm:$0xf0]  ;;  %v4726_v60 = vld [vmem:[#allocation8 + $0x224] sm:$0xf] }
 0x103   :  { %2556 = vmatpush.bf16.msrb.mxu3 %v3825_v29  ;;  %2569 = vmatpush.bf16.msrb.mxu1 %v3953_v34  ;;  %v4662_v29 = vld [vmem:[#allocation8 + $0x24] sm:$0xf]  ;;  %v4097_v34 = vor.u32 %v4728_v8, %v4096_v26  ;;  %v4776_v26 = vld [vmem:[#allocation8 + $0x3ac] sm:$0xf0] }
 0x105   :  { %v1680_v20 = vpop.f32.mrf.mxu3 }
 0x106   :  { %2557 = vmatmul.bf16.vlgmr.msrb.gmra.mxu3 %v5142_v54  ;;  %v1656_v23 = vpop.f32.mrf.mxu0  ;;  %2581 = vmatpush.bf16.msrb.mxu2 %v4097_v34  ;;  %v1681_v32 = vadd.f32 %v1680_v20, %v1668_v52  ;;  %v3913_v20 = vor.u32 %v4681_v10, %v3912_v6  ;;  %v3880_v34 = vld [vmem:[#allocation8 + $0x68] sm:$0xf]  ;;  %v4669_v52 = vld [vmem:[#allocation8 + $0x54] sm:$0xf0]  ;;  %v4240_v6 = vld [vmem:[#allocation8 + $0x340] sm:$0xf] }
 0x107   :  { %2601 = vmatpush.bf16.msra.mxu3 %v3941_v31  ;;  %2614 = vmatpush.bf16.msra.mxu1 %v4069_v41  ;;  %v3845_v41 = vor.u32 %v4662_v29, %v3842_v30  ;;  %v4073_v23 = vor.u32 %v4721_v16, %v4072_v15  ;;  %v4717_v29 = vld [vmem:[#allocation8 + $0x1d4] sm:$0xf0]  ;;  %v3865_v58 = vor.u32 %v4669_v52, %v3864_v49  ;;  %v4722_v16 = vld [vmem:[#allocation8 + $0x204] sm:$0xf]  ;;  %v3914_v52 = vld [vmem:[#allocation8 + $0xb8] sm:$0xf0] }
 0x108   :  { %v1693_v24 = vpop.f32.mrf.mxu2  ;;  %v4661_v15 = vld [vmem:[#allocation8 + $0x14] sm:$0xf0] }
 0x109   :  { %v1669_v31 = vpop.f32.mrf.mxu1  ;;  %v1694_v3 = vadd.f32 %v1693_v24, %v1681_v32  ;;  %v4146_v24 = vld [vmem:[#allocation8 + $0x290] sm:$0xf0]  ;;  %v4768_v32 = vld [vmem:[#allocation8 + $0x36c] sm:$0xf0] }
 0x10a   :  { %2582 = vmatpush.bf16.msrb.mxu2 %v4081_v17  ;;  %v4149_v30 = vor.u32 %v4738_v22, %v4146_v24  ;;  %v4713_v17 = vld [vmem:[#allocation8 + $0x1b4] sm:$0xf0]  ;;  %v4760_v22 = vld [vmem:[#allocation8 + $0x32c] sm:$0xf0]  ;;  %v4687_v24 = vld [vmem:[#allocation8 + $0xec] sm:$0xf] }
 0x10b   :  { %2602 = vmatpush.bf16.msra.mxu3 %v3925_v45  ;;  %2615 = vmatpush.bf16.msra.mxu1 %v4053_v50  ;;  %v3973_v45 = vor.u32 %v4694_v35, %v3970_v36  ;;  %v4690_v50 = vld [vmem:[#allocation8 + $0x104] sm:$0xf]  ;;  %v4130_v36 = vld [vmem:[#allocation8 + $0x270] sm:$0xf0] }
 0x10c   :  { %v4734_v35 = vld [vmem:[#allocation8 + $0x264] sm:$0xf] }
 0x10d   :  { %v1682_v48 = vpop.f32.mrf.mxu3  ;;  %v4133_v43 = vor.u32 %v4734_v35, %v4130_v36 }
 0x10e   :  { %2627 = vmatpush.bf16.msra.mxu2 %v4197_v51 }
 0x10f   :  { %2603 = vmatpush.bf16.msra.mxu3 %v3909_v27  ;;  %2616 = vmatpush.bf16.msra.mxu1 %v4037_v37  ;;  %v3829_v27 = vor.u32 %v4658_v40, %v3826_v42  ;;  %v3957_v37 = vor.u32 %v4690_v50, %v3954_v63  ;;  %v4673_v42 = vld [vmem:[#allocation8 + $0x74] sm:$0xf0]  ;;  %v4730_v50 = vld [vmem:[#allocation8 + $0x244] sm:$0xf]  ;;  %v4114_v63 = vld [vmem:[#allocation8 + $0x250] sm:$0xf0] }
 0x110   :  { %v1695_v53 = vpop.f32.mrf.mxu2  ;;  %v3881_v48 = vor.u32 %v4673_v42, %v3880_v34  ;;  %v4683_v34 = vld [vmem:[#allocation8 + $0xcc] sm:$0xf]  ;;  %v3930_v42 = vld [vmem:[#allocation8 + $0xd8] sm:$0xf0] }
 0x111   :  { %v4256_v53 = vld [vmem:[#allocation8 + $0x360] sm:$0xf]  ;;  %v3933_v49 = vor.u32 %v4683_v34, %v3930_v42  ;;  %v3850_v42 = vld [vmem:[#allocation8 + $0x38] sm:$0xf0] }
 0x112   :  { %2628 = vmatpush.bf16.msra.mxu2 %v4181_v62  ;;  %v4098_v62 = vld [vmem:[#allocation8 + $0x230] sm:$0xf0] }
 0x113   :  { %2604 = vmatpush.bf16.msra.mxu3 %v3893_v0  ;;  %2617 = vmatpush.bf16.msra.mxu1 %v4021_v39  ;;  %v4320_v0 = vld [vmem:[#allocation8 + $0x3e0] sm:$0xf]  ;;  %v4162_v39 = vld [vmem:[#allocation8 + $0x2b0] sm:$0xf0] }
 0x114   :  { %v4321_v2 = vor.u32 %v4784_v1, %v4320_v0  ;;  %v4165_v11 = vor.u32 %v4742_v7, %v4162_v39  ;;  %v4764_v7 = vld [vmem:[#allocation8 + $0x34c] sm:$0xf0]  ;;  %v4008_v39 = vld [vmem:[#allocation8 + $0x168] sm:$0xf] }
 0x115   :  { %v1706_v9 = vpop.f32.mrf.mxu3  ;;  %v4241_v10 = vor.u32 %v4764_v7, %v4240_v6  ;;  %v4715_v7 = vld [vmem:[#allocation8 + $0x1cc] sm:$0xf] }
 0x116   :  { %2588 = vmatpush.bf16.msrb.mxu0 %v4321_v2  ;;  %v1707_v14 = vadd.f32 %v1706_v9, %v1694_v3  ;;  %2629 = vmatpush.bf16.msra.mxu2 %v4165_v11  ;;  %v4665_v3 = vld [vmem:[#allocation8 + $0x34] sm:$0xf0] }
 0x117   :  { %2605 = vmatpush.bf16.msra.mxu3 %v3877_v12  ;;  %2618 = vmatpush.bf16.msra.mxu1 %v4005_v19  ;;  %v4304_v12 = vld [vmem:[#allocation8 + $0x3c0] sm:$0xf]  ;;  %v3896_v19 = vld [vmem:[#allocation8 + $0x88] sm:$0xf]  ;;  %v4705_v9 = vld [vmem:[#allocation8 + $0x174] sm:$0xf0] }
 0x118   :  { %v4305_v56 = vor.u32 %v4780_v13, %v4304_v12  ;;  %v1893_v61 = vmax.f32 %v1707_v14, 0.0  ;;  %v3897_v31 = vor.u32 %v4677_v21, %v3896_v19  ;;  %v3832_v12 = vld [vmem:[#allocation8 + $0x8] sm:$0xf]  ;;  %v3849_v14 = vor.u32 %v4665_v3, %v3848_v59  ;;  %v4224_v21 = vld [vmem:[#allocation8 + $0x320] sm:$0xf] }
 0x119   :  { %v4009_v19 = vor.u32 %v4705_v9, %v4008_v39  ;;  %v4774_v3 = vld [vmem:[#allocation8 + $0x3a4] sm:$0xf] }
 0x11a   :  { %2589 = vmatpush.bf16.msrb.mxu0 %v4305_v56  ;;  %v5149_v8 = vpack.c.bf16 %v1893_v61, %v1893_v61  ;;  %2630 = vmatpush.bf16.msra.mxu2 %v4149_v30  ;;  %v4082_v56 = vld [vmem:[#allocation8 + $0x210] sm:$0xf0]  ;;  %v3992_v61 = vld [vmem:[#allocation8 + $0x148] sm:$0xf]  ;;  %v4697_v30 = vld [vmem:[#allocation8 + $0x134] sm:$0xf0] }
 0x11b   :  { %2606 = vmatpush.bf16.msra.mxu3 %v3861_v25  ;;  %2619 = vmatpush.bf16.msra.mxu1 %v3989_v33  ;;  %v4288_v25 = vld [vmem:[#allocation8 + $0x3a0] sm:$0xf] }
 0x11c   :  { %v4289_v33 = vor.u32 %v4776_v26, %v4288_v25  ;;  %2570 = vmatmul.bf16.vlgmr.msrb.gmra.mxu1 %v5149_v8  ;;  %v3946_v25 = vld [vmem:[#allocation8 + $0xf8] sm:$0xf0]  ;;  %v4225_v26 = vor.u32 %v4760_v22, %v4224_v21  ;;  %v4667_v21 = vld [vmem:[#allocation8 + $0x4c] sm:$0xf] }
 0x11d   :  { %v1708_v38 = vpop.f32.mrf.mxu3 }
 0x11e   :  { %v5152_v40 = vpop.f32.mrf.mxu0  ;;  %2590 = vmatpush.bf16.msrb.mxu0 %v4289_v33  ;;  %2631 = vmatpush.bf16.msra.mxu2 %v4133_v43  ;;  %v4208_v38 = vld [vmem:[#allocation8 + $0x300] sm:$0xf] }
 0x11f   :  { %2607 = vmatpush.bf16.msra.mxu3 %v3845_v41  ;;  %2620 = vmatpush.bf16.msra.mxu1 %v3973_v45  ;;  %v4057_v41 = vor.u32 %v4717_v29, %v4056_v28  ;;  %v4040_v45 = vld [vmem:[#allocation8 + $0x1a8] sm:$0xf]  ;;  %v5154_v47 = vpop.f32.mrf.mxu1  ;;  %v3833_v28 = vor.u32 %v4661_v15, %v3832_v12  ;;  %v4671_v12 = vld [vmem:[#allocation8 + $0x6c] sm:$0xf]  ;;  %v4770_v15 = vld [vmem:[#allocation8 + $0x384] sm:$0xf] }
 0x120   :  { %v4041_v51 = vor.u32 %v4713_v17, %v4040_v45  ;;  %v3976_v29 = vld [vmem:[#allocation8 + $0x128] sm:$0xf]  ;;  %v538_v45 = vperm.slane %v5125_v4, 2 }
 0x122   :  { %2591 = vmatpush.bf16.msrb.mxu0 %v4273_v46  ;;  %v4325_v46 = vor.u32 %v4782_v44, %v4322_v18  ;;  %v4242_v44 = vld [vmem:[#allocation8 + $0x350] sm:$0xf0] }
 0x123   :  { %2608 = vmatpush.bf16.msra.mxu3 %v3829_v27  ;;  %2621 = vmatpush.bf16.msra.mxu1 %v3957_v37  ;;  %v4117_v27 = vor.u32 %v4730_v50, %v4114_v63  ;;  %v4257_v37 = vor.u32 %v4768_v32, %v4256_v53  ;;  %v3960_v50 = vld [vmem:[#allocation8 + $0x108] sm:$0xf]  ;;  %v4693_v63 = vld [vmem:[#allocation8 + $0x114] sm:$0xf0]  ;;  %v4306_v53 = vld [vmem:[#allocation8 + $0x3d0] sm:$0xf0]  ;;  %v1720_v32 = vadd.f32 %v5154_v47, %v538_v45 }
 0x124   :  { %v4058_v47 = vld [vmem:[#allocation8 + $0x1d8] sm:$0xf0]  ;;  %v4703_v45 = vld [vmem:[#allocation8 + $0x16c] sm:$0xf] }
 0x125   :  { %2632 = vmatpush.bf16.msra.mxu2 %v4117_v27  ;;  %v4778_v27 = vld [vmem:[#allocation8 + $0x3c4] sm:$0xf] }
 0x126   :  { %2609 = vmatmul.bf16.vlgmr.msra.gmra.mxu3 %v5142_v54  ;;  %v1747_v1 = vpop.f32.mrf.mxu0  ;;  %2592 = vmatpush.bf16.msrb.mxu0 %v4257_v37  ;;  %v4309_v37 = vor.u32 %v4778_v27, %v4306_v53  ;;  %v3834_v27 = vld [vmem:[#allocation8 + $0x18] sm:$0xf0]  ;;  %v4758_v53 = vld [vmem:[#allocation8 + $0x324] sm:$0xf] }
 0x127   :  { %2653 = vmatpush.bf16.msrb.mxu3 %v3945_v55  ;;  %2666 = vmatpush.bf16.msrb.mxu1 %v4073_v23  ;;  %v4024_v55 = vld [vmem:[#allocation8 + $0x188] sm:$0xf]  ;;  %v1721_v13 = vpop.f32.mrf.mxu1  ;;  %v4701_v23 = vld [vmem:[#allocation8 + $0x154] sm:$0xf0] }
 0x128   :  { %v4025_v2 = vor.u32 %v4709_v57, %v4024_v55  ;;  %v5158_v11 = vpop.f32.mrf.mxu2  ;;  %v3993_v33 = vor.u32 %v4701_v23, %v3992_v61  ;;  %v4719_v55 = vld [vmem:[#allocation8 + $0x1ec] sm:$0xf]  ;;  %v4074_v57 = vld [vmem:[#allocation8 + $0x1f8] sm:$0xf0]  ;;  %v4061_v13 = vor.u32 %v4715_v7, %v4058_v47  ;;  %v4210_v7 = vld [vmem:[#allocation8 + $0x310] sm:$0xf0] }
 0x129   :  { %v5156_v0 = vpop.f32.mrf.mxu3  ;;  %v4077_v1 = vor.u32 %v4719_v55, %v4074_v57  ;;  %v4042_v61 = vld [vmem:[#allocation8 + $0x1b8] sm:$0xf0]  ;;  %v4699_v57 = vld [vmem:[#allocation8 + $0x14c] sm:$0xf] }
 0x12a   :  { %2593 = vmatpush.bf16.msrb.mxu0 %v4241_v10  ;;  %v1733_v6 = vadd.f32 %v5156_v0, %v1720_v32  ;;  %v3866_v23 = vld [vmem:[#allocation8 + $0x58] sm:$0xf0]  ;;  %v4226_v32 = vld [vmem:[#allocation8 + $0x330] sm:$0xf0]  ;;  %v4695_v47 = vld [vmem:[#allocation8 + $0x12c] sm:$0xf] }
 0x12b   :  { %2654 = vmatpush.bf16.msrb.mxu3 %v3929_v5  ;;  %2667 = vmatpush.bf16.msrb.mxu1 %v4057_v41  ;;  %v4101_v5 = vor.u32 %v4726_v60, %v4098_v62  ;;  %v4756_v41 = vld [vmem:[#allocation8 + $0x30c] sm:$0xf0]  ;;  %v4675_v60 = vld [vmem:[#allocation8 + $0x8c] sm:$0xf] }
 0x12c   :  { %2622 = vmatmul.bf16.vlgmr.msra.gmra.mxu1 %v5149_v8  ;;  %v4209_v43 = vor.u32 %v4756_v41, %v4208_v38 }
 0x12d   :  { %2633 = vmatpush.bf16.msra.mxu2 %v4101_v5  ;;  %v4290_v5 = vld [vmem:[#allocation8 + $0x3b0] sm:$0xf0] }
 0x12e   :  { %v5161_v36 = vpop.f32.mrf.mxu0  ;;  %2594 = vmatpush.bf16.msrb.mxu0 %v4225_v26  ;;  %v4293_v39 = vor.u32 %v4774_v3, %v4290_v5 }
 0x12f   :  { %2655 = vmatpush.bf16.msrb.mxu3 %v3913_v20  ;;  %2668 = vmatpush.bf16.msrb.mxu1 %v4041_v51  ;;  %v4085_v20 = vor.u32 %v4722_v16, %v4082_v56  ;;  %v4679_v51 = vld [vmem:[#allocation8 + $0xac] sm:$0xf]  ;;  %v4274_v16 = vld [vmem:[#allocation8 + $0x390] sm:$0xf0]  ;;  %v1746_v56 = vadd.f32 %v5152_v40, %v1733_v6  ;;  %v4754_v6 = vld [vmem:[#allocation8 + $0x304] sm:$0xf] }
 0x130   :  { %v1760_v17 = vpop.f32.mrf.mxu2  ;;  %v3917_v59 = vor.u32 %v4679_v51, %v3914_v52  ;;  %v4277_v0 = vor.u32 %v4770_v15, %v4274_v16  ;;  %v4659_v51 = vld [vmem:[#allocation8 + $0xc] sm:$0xf] }
 0x131   :  { %v1734_v35 = vpop.f32.mrf.mxu3  ;;  %2634 = vmatpush.bf16.msra.mxu2 %v4085_v20  ;;  %v1759_v26 = vadd.f32 %v5158_v11, %v1746_v56  ;;  %v4010_v11 = vld [vmem:[#allocation8 + $0x178] sm:$0xf0]  ;;  %v4691_v16 = vld [vmem:[#allocation8 + $0x10c] sm:$0xf] }
 0x132   :  { %2595 = vmatpush.bf16.msrb.mxu0 %v4209_v43  ;;  %v4663_v35 = vld [vmem:[#allocation8 + $0x2c] sm:$0xf]  ;;  %v4762_v43 = vld [vmem:[#allocation8 + $0x344] sm:$0xf]  ;;  %v4013_v52 = vor.u32 %v4703_v45, %v4010_v11  ;;  %v3962_v56 = vld [vmem:[#allocation8 + $0x118] sm:$0xf0] }
 0x133   :  { %2656 = vmatpush.bf16.msrb.mxu3 %v3897_v31  ;;  %2669 = vmatpush.bf16.msrb.mxu1 %v4025_v2  ;;  %v3949_v31 = vor.u32 %v4687_v24, %v3946_v25  ;;  %v3898_v2 = vld [vmem:[#allocation8 + $0x98] sm:$0xf0]  ;;  %v4766_v24 = vld [vmem:[#allocation8 + $0x364] sm:$0xf]  ;;  %v4258_v25 = vld [vmem:[#allocation8 + $0x370] sm:$0xf0] }
 0x134   :  { %v3901_v10 = vor.u32 %v4675_v60, %v3898_v2  ;;  %v4261_v40 = vor.u32 %v4766_v24, %v4258_v25  ;;  %v4749_v2 = vld [vmem:[#allocation8 + $0x2d4] sm:$0xf0]  ;;  %v4751_v11 = vld [vmem:[#allocation8 + $0x2ec] sm:$0xf] }
 0x135   :  { %v4737_v24 = vld [vmem:[#allocation8 + $0x274] sm:$0xf0] }
 0x136   :  { %2640 = vmatpush.bf16.msra.mxu0 %v4325_v46  ;;  %v1799_v62 = vpop.f32.mrf.mxu0  ;;  %v4245_v46 = vor.u32 %v4762_v43, %v4242_v44 }
 0x137   :  { %2657 = vmatpush.bf16.msrb.mxu3 %v3881_v48  ;;  %2670 = vmatpush.bf16.msrb.mxu1 %v4009_v19  ;;  %v3977_v48 = vor.u32 %v4697_v30, %v3976_v29  ;;  %v4711_v19 = vld [vmem:[#allocation8 + $0x1ac] sm:$0xf]  ;;  %v4026_v29 = vld [vmem:[#allocation8 + $0x198] sm:$0xf0] }
 0x138   :  { %v4045_v22 = vor.u32 %v4711_v19, %v4042_v61  ;;  %v4152_v61 = vld [vmem:[#allocation8 + $0x288] sm:$0xf] }
 0x13a   :  { %2641 = vmatpush.bf16.msra.mxu0 %v4309_v37  ;;  %v3994_v37 = vld [vmem:[#allocation8 + $0x158] sm:$0xf0] }
 0x13b   :  { %2658 = vmatpush.bf16.msrb.mxu3 %v3865_v58  ;;  %2671 = vmatpush.bf16.msrb.mxu1 %v3993_v33  ;;  %v3961_v58 = vor.u32 %v4693_v63, %v3960_v50  ;;  %v4200_v50 = vld [vmem:[#allocation8 + $0x2e8] sm:$0xf]  ;;  %v4753_v63 = vld [vmem:[#allocation8 + $0x2f4] sm:$0xf0]  ;;  %v3997_v3 = vor.u32 %v4699_v57, %v3994_v37 }
 0x13c   :  { %v4201_v60 = vor.u32 %v4753_v63, %v4200_v50  ;;  %v4747_v63 = vld [vmem:[#allocation8 + $0x2cc] sm:$0xf] }
 0x13e   :  { %2642 = vmatpush.bf16.msra.mxu0 %v4293_v39  ;;  %v3978_v39 = vld [vmem:[#allocation8 + $0x138] sm:$0xf0] }
 0x13f   :  { %2659 = vmatpush.bf16.msrb.mxu3 %v3849_v14  ;;  %2672 = vmatpush.bf16.msrb.mxu1 %v3977_v48  ;;  %v1771_v9 = vpop.f32.mrf.mxu1  ;;  %v3882_v14 = vld [vmem:[#allocation8 + $0x78] sm:$0xf0]  ;;  %v3981_v15 = vor.u32 %v4695_v47, %v3978_v39  ;;  %v4296_v39 = vld [vmem:[#allocation8 + $0x3a8] sm:$0xf] }
 0x140   :  { %v3885_v20 = vor.u32 %v4671_v12, %v3882_v14  ;;  %v1772_v33 = vadd.f32 %v1771_v9, %v1759_v26  ;;  %v4745_v14 = vld [vmem:[#allocation8 + $0x2b4] sm:$0xf0]  ;;  %v4154_v47 = vld [vmem:[#allocation8 + $0x298] sm:$0xf0] }
 0x142   :  { %v5170_v30 = vpop.f32.mrf.mxu0  ;;  %2643 = vmatpush.bf16.msra.mxu0 %v4277_v0  ;;  %v4741_v0 = vld [vmem:[#allocation8 + $0x294] sm:$0xf0] }
 0x143   :  { %2660 = vmatpush.bf16.msrb.mxu3 %v3833_v28  ;;  %2673 = vmatpush.bf16.msrb.mxu1 %v3961_v58  ;;  %v4707_v28 = vld [vmem:[#allocation8 + $0x18c] sm:$0xf] }
 0x144   :  { %v4029_v41 = vor.u32 %v4707_v28, %v4026_v29  ;;  %v4120_v29 = vld [vmem:[#allocation8 + $0x248] sm:$0xf] }
 0x146   :  { %2661 = vmatmul.bf16.vlgmr.msrb.gmra.mxu3 %v5142_v54  ;;  %2674 = vmatmul.bf16.vlgmr.msrb.gmra.mxu1 %v5149_v8 }
 0x147   :  { %2705 = vmatpush.bf16.msra.mxu3 %v3949_v31  ;;  %2718 = vmatpush.bf16.msra.mxu1 %v4077_v1  ;;  %v3869_v31 = vor.u32 %v4667_v21, %v3866_v23  ;;  %v1773_v34 = vpop.f32.mrf.mxu1  ;;  %v4184_v1 = vld [vmem:[#allocation8 + $0x2c8] sm:$0xf]  ;;  %v3965_v21 = vor.u32 %v4691_v16, %v3962_v56  ;;  %v4773_v16 = vld [vmem:[#allocation8 + $0x394] sm:$0xf0] }
 0x148   :  { %v1810_v17 = vpop.f32.mrf.mxu2  ;;  %2644 = vmatpush.bf16.msra.mxu0 %v4261_v40  ;;  %v4185_v12 = vor.u32 %v4749_v2, %v4184_v1  ;;  %v4136_v23 = vld [vmem:[#allocation8 + $0x268] sm:$0xf]  ;;  %v4729_v34 = vld [vmem:[#allocation8 + $0x234] sm:$0xf0] }
 0x149   :  { %v1784_v38 = vpop.f32.mrf.mxu3  ;;  %v4137_v28 = vor.u32 %v4737_v24, %v4136_v23  ;;  %v4312_v1 = vld [vmem:[#allocation8 + $0x3c8] sm:$0xf]  ;;  %v4781_v2 = vld [vmem:[#allocation8 + $0x3d4] sm:$0xf0]  ;;  %v4727_v24 = vld [vmem:[#allocation8 + $0x22c] sm:$0xf] }
 0x14a   :  { %v1785_v18 = vadd.f32 %v1784_v38, %v1772_v33  ;;  %v1825_v58 = vpop.f32.mrf.mxu0 }
 0x14b   :  { %2706 = vmatpush.bf16.msra.mxu3 %v3933_v49  ;;  %2719 = vmatpush.bf16.msra.mxu1 %v4061_v13  ;;  %v3853_v49 = vor.u32 %v4663_v35, %v3850_v42  ;;  %v4168_v13 = vld [vmem:[#allocation8 + $0x2a8] sm:$0xf] }
 0x14c   :  { %v1798_v48 = vadd.f32 %v5161_v36, %v1785_v18  ;;  %2645 = vmatpush.bf16.msra.mxu0 %v4245_v46  ;;  %v3837_v36 = vor.u32 %v4659_v51, %v3834_v27  ;;  %v4169_v19 = vor.u32 %v4745_v14, %v4168_v13  ;;  %v4088_v18 = vld [vmem:[#allocation8 + $0x208] sm:$0xf]  ;;  %v4186_v51 = vld [vmem:[#allocation8 + $0x2d8] sm:$0xf0]  ;;  %v4735_v13 = vld [vmem:[#allocation8 + $0x26c] sm:$0xf] }
 0x14d   :  { %v4189_v37 = vor.u32 %v4747_v63, %v4186_v51  ;;  %v4138_v14 = vld [vmem:[#allocation8 + $0x278] sm:$0xf0]  ;;  %v5188_v51 = vld [vmem:[#allocation10] sm:$0xf] }
 0x14e   :  { %v1894_v55 = vmax.f32 %v1798_v48, 0.0  ;;  %v4141_v56 = vor.u32 %v4735_v13, %v4138_v14  ;;  %v4282_v63 = vld [vmem:[#allocation8 + $0x398] sm:$0xf0] }
 0x14f   :  { %2707 = vmatpush.bf16.msra.mxu3 %v3917_v59  ;;  %2720 = vmatpush.bf16.msra.mxu1 %v4045_v22  ;;  %v4229_v59 = vor.u32 %v4758_v53, %v4226_v32  ;;  %v4153_v22 = vor.u32 %v4741_v0, %v4152_v61  ;;  %v4328_v53 = vld [vmem:[#allocation8 + $0x3e8] sm:$0xf]  ;;  %v4785_v32 = vld [vmem:[#allocation8 + $0x3f4] sm:$0xf0]  ;;  %v4731_v61 = vld [vmem:[#allocation8 + $0x24c] sm:$0xf] }
 0x150   :  { %v5173_v62 = vpack.c.bf16 %v1894_v55, %v1894_v55  ;;  %v1812_v9 = vpop.f32.mrf.mxu2  ;;  %v4329_v58 = vor.u32 %v4785_v32, %v4328_v53  ;;  %v4122_v0 = vld [vmem:[#allocation8 + $0x258] sm:$0xf0] }
 0x151   :  { %v1786_v5 = vpop.f32.mrf.mxu3  ;;  %2646 = vmatpush.bf16.msra.mxu0 %v4229_v59  ;;  %v4743_v59 = vld [vmem:[#allocation8 + $0x2ac] sm:$0xf]  ;;  %v4777_v9 = vld [vmem:[#allocation8 + $0x3b4] sm:$0xf0]  ;;  %v4266_v53 = vld [vmem:[#allocation8 + $0x378] sm:$0xf0] }
 0x152   :  { %2583 = vmatmul.bf16.vlgmr.msrb.gmra.mxu2 %v5173_v62 }
 0x153   :  { %2708 = vmatpush.bf16.msra.mxu3 %v3901_v10  ;;  %2721 = vmatpush.bf16.msra.mxu1 %v4029_v41  ;;  %v4213_v10 = vor.u32 %v4754_v6, %v4210_v7  ;;  %v4313_v6 = vor.u32 %v4781_v2, %v4312_v1  ;;  %v4739_v7 = vld [vmem:[#allocation8 + $0x28c] sm:$0xf] }
 0x154   :  { %2679 = vmatpush.bf16.msrb.mxu2 %v4201_v60  ;;  %v4170_v60 = vld [vmem:[#allocation8 + $0x2b8] sm:$0xf0]  ;;  %v4759_v2 = vld [vmem:[#allocation8 + $0x32c] sm:$0xf] }
 0x155   :  { %2647 = vmatpush.bf16.msra.mxu0 %v4213_v10  ;;  %v4157_v10 = vor.u32 %v4739_v7, %v4154_v47  ;;  %v4218_v7 = vld [vmem:[#allocation8 + $0x318] sm:$0xf0] }
 0x157   :  { %2709 = vmatpush.bf16.msra.mxu3 %v3885_v20  ;;  %2722 = vmatpush.bf16.msra.mxu1 %v4013_v52  ;;  %v539_v20 = vperm.slane %v5125_v4, 3 }
 0x158   :  { %2680 = vmatpush.bf16.msrb.mxu2 %v4185_v12  ;;  %v4297_v12 = vor.u32 %v4777_v9, %v4296_v39 }
 0x159   :  { %v1811_v25 = vadd.f32 %v1810_v17, %v539_v20  ;;  %v4202_v17 = vld [vmem:[#allocation8 + $0x2f8] sm:$0xf0]  ;;  %v4264_v20 = vld [vmem:[#allocation8 + $0x368] sm:$0xf] }
 0x15b   :  { %2710 = vmatpush.bf16.msra.mxu3 %v3869_v31  ;;  %2723 = vmatpush.bf16.msra.mxu1 %v3997_v3  ;;  %v1824_v40 = vadd.f32 %v5170_v30, %v1811_v25  ;;  %v4104_v31 = vld [vmem:[#allocation8 + $0x228] sm:$0xf]  ;;  %v4173_v3 = vor.u32 %v4743_v59, %v4170_v60  ;;  %v4106_v25 = vld [vmem:[#allocation8 + $0x238] sm:$0xf0] }
 0x15c   :  { %2681 = vmatpush.bf16.msrb.mxu2 %v4169_v19  ;;  %v4105_v44 = vor.u32 %v4729_v34, %v4104_v31  ;;  %v4232_v31 = vld [vmem:[#allocation8 + $0x328] sm:$0xf]  ;;  %v4761_v34 = vld [vmem:[#allocation8 + $0x334] sm:$0xf0] }
 0x15f   :  { %2711 = vmatpush.bf16.msra.mxu3 %v3853_v49  ;;  %2724 = vmatpush.bf16.msra.mxu1 %v3981_v15  ;;  %v1836_v26 = vpop.f32.mrf.mxu1  ;;  %v4205_v49 = vor.u32 %v4751_v11, %v4202_v17  ;;  %v4280_v15 = vld [vmem:[#allocation8 + $0x388] sm:$0xf]  ;;  %v4779_v11 = vld [vmem:[#allocation8 + $0x3cc] sm:$0xf]  ;;  %v4314_v17 = vld [vmem:[#allocation8 + $0x3d8] sm:$0xf0] }
 0x160   :  { %2682 = vmatpush.bf16.msrb.mxu2 %v4153_v22  ;;  %v1837_v35 = vadd.f32 %v1836_v26, %v1824_v40  ;;  %v4281_v19 = vor.u32 %v4773_v16, %v4280_v15  ;;  %v4125_v22 = vor.u32 %v4731_v61, %v4122_v0  ;;  %v4248_v26 = vld [vmem:[#allocation8 + $0x348] sm:$0xf]  ;;  %v4793_v15 = vld [vmem:[#allocation11 + $0x38] sm:$0xff] }
 0x161   :  { %v1875_v4 = vpop.f32.mrf.mxu0 }
 0x162   :  { %2635 = vmatmul.bf16.vlgmr.msra.gmra.mxu2 %v5173_v62 }
 0x163   :  { %2712 = vmatpush.bf16.msra.mxu3 %v3837_v36  ;;  %2725 = vmatpush.bf16.msra.mxu1 %v3965_v21  ;;  %v4769_v21 = vld [vmem:[#allocation8 + $0x374] sm:$0xf0] }
 0x164   :  { %2683 = vmatpush.bf16.msrb.mxu2 %v4137_v28  ;;  %v4265_v23 = vor.u32 %v4769_v21, %v4264_v20  ;;  %v4765_v28 = vld [vmem:[#allocation8 + $0x354] sm:$0xf0]  ;;  %v4791_v20 = vld [vmem:[#allocation11 + $0x28] sm:$0xff] }
 0x165   :  { %v4249_v40 = vor.u32 %v4765_v28, %v4248_v26  ;;  %v4801_v26 = vld [vmem:[#allocation11 + $0x78] sm:$0xff]  ;;  %v4788_v28 = vld [vmem:[#allocation11 + $0x10] sm:$0xff] }
 0x166   :  { %2713 = vmatmul.bf16.vlgmr.msra.gmra.mxu3 %v5142_v54  ;;  %2726 = vmatmul.bf16.vlgmr.msra.gmra.mxu1 %v5149_v8  ;;  %v4733_v54 = vld [vmem:[#allocation8 + $0x254] sm:$0xf0] }
 0x167   :  { %v4121_v33 = vor.u32 %v4733_v54, %v4120_v29  ;;  %v1838_v38 = vpop.f32.mrf.mxu1  ;;  %v4725_v8 = vld [vmem:[#allocation8 + $0x214] sm:$0xf0]  ;;  %v4109_v54 = vor.u32 %v4727_v24, %v4106_v25  ;;  %2960 = vmatpush.bf16.msrb.mxu3 %v4793_v15  ;;  %v4789_v25 = vld [vmem:[#allocation11 + $0x18] sm:$0xff]  ;;  %2973 = vmatpush.bf16.msrb.mxu1 %v4801_v26  ;;  %v4811_v15 = vld [vmem:[#allocation11 + $0xc8] sm:$0xff] }
 0x168   :  { %v1862_v43 = vpop.f32.mrf.mxu2  ;;  %v4089_v48 = vor.u32 %v4725_v8, %v4088_v18  ;;  %v4233_v38 = vor.u32 %v4761_v34, %v4232_v31  ;;  %v4330_v18 = vld [vmem:[#allocation8 + $0x3f8] sm:$0xf0]  ;;  %v1904_v34 = vperm.slane %v5188_v51, 3 }
 0x169   :  { %v1849_v41 = vpop.f32.mrf.mxu3  ;;  %2684 = vmatpush.bf16.msrb.mxu2 %v4121_v33  ;;  %v1877_v30 = vpop.f32.mrf.mxu0  ;;  %v4090_v33 = vld [vmem:[#allocation8 + $0x218] sm:$0xf0] }
 0x16a   :  { %v1850_v42 = vadd.f32 %v1849_v41, %v1837_v35  ;;  %v4216_v41 = vld [vmem:[#allocation8 + $0x308] sm:$0xf]  ;;  %v4317_v30 = vor.u32 %v4779_v11, %v4314_v17  ;;  %v4795_v11 = vld [vmem:[#allocation11 + $0x48] sm:$0xff] }
 0x16b   :  { %v4807_v17 = vld [vmem:[#allocation11 + $0xa8] sm:$0xff] }
 0x16c   :  { %v1863_v45 = vadd.f32 %v1862_v43, %v1850_v42  ;;  %v4757_v42 = vld [vmem:[#allocation8 + $0x314] sm:$0xf0] }
 0x16d   :  { %2685 = vmatpush.bf16.msrb.mxu2 %v4105_v44  ;;  %v4783_v44 = vld [vmem:[#allocation8 + $0x3ec] sm:$0xf]  ;;  %v4217_v8 = vor.u32 %v4757_v42, %v4216_v41 }
 0x16e   :  { %v1876_v46 = vadd.f32 %v1875_v4, %v1863_v45  ;;  %v4723_v4 = vld [vmem:[#allocation8 + $0x20c] sm:$0xf]  ;;  %v4333_v45 = vor.u32 %v4783_v44, %v4330_v18  ;;  %v4808_v44 = vld [vmem:[#allocation11 + $0xb0] sm:$0xff] }
 0x16f   :  { %v1888_v50 = vpop.f32.mrf.mxu1  ;;  %v4093_v35 = vor.u32 %v4723_v4, %v4090_v33  ;;  %v4786_v4 = vld [vmem:[#allocation11] sm:$0xff] }
 0x170   :  { %v1889_v52 = vadd.f32 %v1888_v50, %v1876_v46  ;;  %v1864_v55 = vpop.f32.mrf.mxu2  ;;  %v4775_v46 = vld [vmem:[#allocation8 + $0x3ac] sm:$0xf]  ;;  %v4798_v33 = vld [vmem:[#allocation11 + $0x60] sm:$0xff] }
 0x171   :  { %v1851_v27 = vpop.f32.mrf.mxu3  ;;  %2686 = vmatpush.bf16.msrb.mxu2 %v4089_v48  ;;  %v4298_v48 = vld [vmem:[#allocation8 + $0x3b8] sm:$0xf0]  ;;  %v4771_v50 = vld [vmem:[#allocation8 + $0x38c] sm:$0xf] }
 0x172   :  { %v1895_v57 = vmax.f32 %v1889_v52, 0.0  ;;  %v4285_v52 = vor.u32 %v4771_v50, %v4282_v63  ;;  %v1901_v27 = vperm.slane %v5188_v51, 0  ;;  %v4805_v63 = vld [vmem:[#allocation11 + $0x98] sm:$0xff] }
 0x174   :  { %v5181_v36 = vpack.c.bf16 %v1895_v57, %v1895_v57  ;;  %2687 = vmatmul.bf16.vlgmr.msrb.gmra.mxu2 %v5173_v62  ;;  %v4763_v57 = vld [vmem:[#allocation8 + $0x34c] sm:$0xf] }
 0x175   :  { %2731 = vmatpush.bf16.msra.mxu2 %v4205_v49  ;;  %v4301_v49 = vor.u32 %v4775_v46, %v4298_v48  ;;  %v4794_v46 = vld [vmem:[#allocation11 + $0x40] sm:$0xff] }
 0x176   :  { %2596 = vmatmul.bf16.vlgmr.msrb.gmra.mxu0 %v5181_v36  ;;  %v4806_v48 = vld [vmem:[#allocation11 + $0xa0] sm:$0xff] }
 0x177   :  { %2692 = vmatpush.bf16.msrb.mxu0 %v4329_v58  ;;  %v1890_v5 = vpop.f32.mrf.mxu1 }
 0x179   :  { %2732 = vmatpush.bf16.msra.mxu2 %v4189_v37  ;;  %v4250_v37 = vld [vmem:[#allocation8 + $0x358] sm:$0xf0] }
 0x17a   :  { %v4253_v1 = vor.u32 %v4763_v57, %v4250_v37  ;;  %v4802_v57 = vld [vmem:[#allocation11 + $0x80] sm:$0xff]  ;;  %v4817_v37 = vld [vmem:[#allocation11 + $0xf8] sm:$0xff] }
 0x17b   :  { %2693 = vmatpush.bf16.msrb.mxu0 %v4313_v6  ;;  %v4755_v6 = vld [vmem:[#allocation8 + $0x30c] sm:$0xf] }
 0x17c   :  { %v4221_v9 = vor.u32 %v4755_v6, %v4218_v7  ;;  %v4814_v6 = vld [vmem:[#allocation11 + $0xe0] sm:$0xff] }
 0x17d   :  { %2733 = vmatpush.bf16.msra.mxu2 %v4173_v3  ;;  %v4234_v3 = vld [vmem:[#allocation8 + $0x338] sm:$0xf0] }
 0x17e   :  { %v4237_v5 = vor.u32 %v4759_v2, %v4234_v3  ;;  %v4815_v3 = vld [vmem:[#allocation11 + $0xe8] sm:$0xff] }
 0x17f   :  { %2694 = vmatpush.bf16.msrb.mxu0 %v4297_v12 }
 0x181   :  { %2734 = vmatpush.bf16.msra.mxu2 %v4157_v10  ;;  %v1902_v10 = vperm.slane %v5188_v51, 1 }
 0x183   :  { %2695 = vmatpush.bf16.msrb.mxu0 %v4281_v19  ;;  %v4792_v19 = vld [vmem:[#allocation11 + $0x30] sm:$0xff] }
 0x184   :  { %2961 = vmatpush.bf16.msrb.mxu3 %v4792_v19 }
 0x185   :  { %2735 = vmatpush.bf16.msra.mxu2 %v4141_v56  ;;  %v1903_v56 = vperm.slane %v5188_v51, 2  ;;  %v4804_v51 = vld [vmem:[#allocation11 + $0x90] sm:$0xff] }
 0x186   :  { %2648 = vmatmul.bf16.vlgmr.msra.gmra.mxu0 %v5181_v36 }
 0x187   :  { %2696 = vmatpush.bf16.msrb.mxu0 %v4265_v23  ;;  %v4790_v23 = vld [vmem:[#allocation11 + $0x20] sm:$0xff] }
 0x188   :  { %2962 = vmatpush.bf16.msrb.mxu3 %v4791_v20 }
 0x189   :  { %v2558_v29 = vpop.f32.mrf.mxu3  ;;  %2736 = vmatpush.bf16.msra.mxu2 %v4125_v22 }
 0x18a   :  { %v2559_v55 = vadd.f32 %v2558_v29, %v1901_v27  ;;  %v4800_v29 = vld [vmem:[#allocation11 + $0x70] sm:$0xff] }
 0x18b   :  { %2697 = vmatpush.bf16.msrb.mxu0 %v4249_v40  ;;  %2974 = vmatpush.bf16.msrb.mxu1 %v4800_v29  ;;  %v4799_v40 = vld [vmem:[#allocation11 + $0x68] sm:$0xff] }
 0x18c   :  { %2963 = vmatpush.bf16.msrb.mxu3 %v4790_v23 }
 0x18d   :  { %2737 = vmatpush.bf16.msra.mxu2 %v4109_v54  ;;  %v4787_v54 = vld [vmem:[#allocation11 + $0x8] sm:$0xff] }
 0x18f   :  { %2698 = vmatpush.bf16.msrb.mxu0 %v4233_v38  ;;  %2975 = vmatpush.bf16.msrb.mxu1 %v4799_v40  ;;  %v4809_v38 = vld [vmem:[#allocation11 + $0xb8] sm:$0xff] }
 0x190   :  { %2964 = vmatpush.bf16.msrb.mxu3 %v4789_v25 }
 0x191   :  { %v2560_v43 = vpop.f32.mrf.mxu3  ;;  %2738 = vmatpush.bf16.msra.mxu2 %v4093_v35  ;;  %v4797_v35 = vld [vmem:[#allocation11 + $0x58] sm:$0xff] }
 0x192   :  { %v4796_v43 = vld [vmem:[#allocation11 + $0x50] sm:$0xff] }
 0x193   :  { %2699 = vmatpush.bf16.msrb.mxu0 %v4217_v8  ;;  %2976 = vmatpush.bf16.msrb.mxu1 %v4798_v33 }
 0x194   :  { %2739 = vmatmul.bf16.vlgmr.msra.gmra.mxu2 %v5173_v62  ;;  %v4767_v62 = vld [vmem:[#allocation8 + $0x36c] sm:$0xf]  ;;  %2965 = vmatpush.bf16.msrb.mxu3 %v4788_v28 }
 0x195   :  { %v4269_v32 = vor.u32 %v4767_v62, %v4266_v53  ;;  %2986 = vmatpush.bf16.msrb.mxu2 %v4809_v38  ;;  %v4803_v62 = vld [vmem:[#allocation11 + $0x88] sm:$0xff] }
 0x196   :  { %2700 = vmatmul.bf16.vlgmr.msrb.gmra.mxu0 %v5181_v36 }
 0x197   :  { %2744 = vmatpush.bf16.msra.mxu0 %v4333_v45  ;;  %2977 = vmatpush.bf16.msrb.mxu1 %v4797_v35 }
 0x198   :  { %2966 = vmatpush.bf16.msrb.mxu3 %v4787_v54 }
 0x199   :  { %v2571_v58 = vpop.f32.mrf.mxu1  ;;  %2987 = vmatpush.bf16.msrb.mxu2 %v4808_v44 }
 0x19a   :  { %v5191_v60 = vadd.f32 %v2571_v58, %v2559_v55 }
 0x19b   :  { %2745 = vmatpush.bf16.msra.mxu0 %v4317_v30  ;;  %2978 = vmatpush.bf16.msrb.mxu1 %v4796_v43 }
 0x19c   :  { %2967 = vmatpush.bf16.msrb.mxu3 %v4786_v4 }
 0x19d   :  { %2988 = vmatpush.bf16.msrb.mxu2 %v4807_v17 }
 0x19f   :  { %2746 = vmatpush.bf16.msra.mxu0 %v4301_v49  ;;  %2979 = vmatpush.bf16.msrb.mxu1 %v4795_v11 }
 0x1a1   :  { %v2573_v47 = vpop.f32.mrf.mxu1  ;;  %2989 = vmatpush.bf16.msrb.mxu2 %v4806_v48 }
 0x1a3   :  { %2747 = vmatpush.bf16.msra.mxu0 %v4285_v52  ;;  %2980 = vmatpush.bf16.msrb.mxu1 %v4794_v46 }
 0x1a5   :  { %2990 = vmatpush.bf16.msrb.mxu2 %v4805_v63 }
 0x1a7   :  { %2748 = vmatpush.bf16.msra.mxu0 %v4269_v32 }
 0x1a9   :  { %v2610_v59 = vpop.f32.mrf.mxu3  ;;  %v2623_v13 = vpop.f32.mrf.mxu1  ;;  %2991 = vmatpush.bf16.msrb.mxu2 %v4804_v51 }
 0x1aa   :  { %v2611_v12 = vadd.f32 %v2610_v59, %v1902_v10 }
 0x1ab   :  { %2749 = vmatpush.bf16.msra.mxu0 %v4253_v1  ;;  %v4816_v1 = vld [vmem:[#allocation11 + $0xf0] sm:$0xff] }
 0x1ac   :  { %v5194_v14 = vadd.f32 %v2623_v13, %v2611_v12  ;;  %v4812_v12 = vld [vmem:[#allocation11 + $0xd0] sm:$0xff] }
 0x1ad   :  { %2992 = vmatpush.bf16.msrb.mxu2 %v4803_v62 }
 0x1af   :  { %2750 = vmatpush.bf16.msra.mxu0 %v4237_v5 }
 0x1b1   :  { %v2612_v39 = vpop.f32.mrf.mxu3  ;;  %v2625_v16 = vpop.f32.mrf.mxu1  ;;  %2993 = vmatpush.bf16.msrb.mxu2 %v4802_v57 }
 0x1b2   :  { %v4813_v39 = vld [vmem:[#allocation11 + $0xd8] sm:$0xff] }
 0x1b3   :  { %2751 = vmatpush.bf16.msra.mxu0 %v4221_v9 }
 0x1b6   :  { %2752 = vmatmul.bf16.vlgmr.msra.gmra.mxu0 %v5181_v36 }
 0x1b7   :  { %2999 = vmatpush.bf16.msrb.mxu0 %v4817_v37 }
 0x1bb   :  { %3000 = vmatpush.bf16.msrb.mxu0 %v4816_v1 }
 0x1bf   :  { %3001 = vmatpush.bf16.msrb.mxu0 %v4815_v3 }
 0x1c3   :  { %v2675_v21 = vpop.f32.mrf.mxu1  ;;  %3002 = vmatpush.bf16.msrb.mxu0 %v4814_v6 }
 0x1c7   :  { %3003 = vmatpush.bf16.msrb.mxu0 %v4813_v39 }
 0x1c9   :  { %v2662_v61 = vpop.f32.mrf.mxu3 }
 0x1ca   :  { %v2663_v0 = vadd.f32 %v2662_v61, %v1903_v56  ;;  %v4810_v56 = vld [vmem:[#allocation11 + $0xc0] sm:$0xff] }
 0x1cb   :  { %v2677_v36 = vpop.f32.mrf.mxu1  ;;  %3004 = vmatpush.bf16.msrb.mxu0 %v4812_v12 }
 0x1cc   :  { %v5198_v22 = vadd.f32 %v2675_v21, %v2663_v0 }
 0x1cf   :  { %3005 = vmatpush.bf16.msrb.mxu0 %v4811_v15 }
 0x1d1   :  { %v2664_v24 = vpop.f32.mrf.mxu3 }
 0x1d3   :  { %3006 = vmatpush.bf16.msrb.mxu0 %v4810_v56 }
 0x1d5   :  { %v2584_v31 = vpop.f32.mrf.mxu2 }
 0x1d6   :  { %v2585_v27 = vadd.f32 %v2584_v31, %v5191_v60 }
 0x1dd   :  { %v2586_v8 = vpop.f32.mrf.mxu2 }
 0x1e3   :  { %v2727_v18 = vpop.f32.mrf.mxu1 }
 0x1e5   :  { %v2636_v50 = vpop.f32.mrf.mxu2 }
 0x1e6   :  { %v2637_v60 = vadd.f32 %v2636_v50, %v5194_v14 }
 0x1e9   :  { %v2714_v41 = vpop.f32.mrf.mxu3 }
 0x1ea   :  { %v2715_v42 = vadd.f32 %v2714_v41, %v1904_v34  ;;  %v4829_v34 = vld [vmem:[%s5219_s6] ss:$0 sm:$0xff] }
 0x1eb   :  { %v2729_v49 = vpop.f32.mrf.mxu1 }
 0x1ec   :  { %v5201_v45 = vadd.f32 %v2727_v18, %v2715_v42 }
 0x1ed   :  { %v2638_v52 = vpop.f32.mrf.mxu2 }
 0x1f1   :  { %v2716_v30 = vpop.f32.mrf.mxu3 }
 0x1f3   :  { %v2597_v53 = vpop.f32.mrf.mxu0 }
 0x1f4   :  { %v2598_v32 = vadd.f32 %v2597_v53, %v2585_v27 }
 0x1f6   :  { %v2757_v55 = vmax.f32 %v2598_v32, 0.0 }
 0x1f7   :  { %v2688_v58 = vpop.f32.mrf.mxu2 }
 0x1f8   :  { %v2761_v59 = vpack.c.bf16 %v2757_v55, %v2757_v55  ;;  %v2689_v16 = vadd.f32 %v2688_v58, %v5198_v22 }
 0x1fa   :  { %2968 = vmatmul.bf16.vlgmr.msrb.gmra.mxu3 %v2761_v59 }
 0x1fb   :  { %v2599_v2 = vpop.f32.mrf.mxu0 }
 0x1ff   :  { %v2690_v5 = vpop.f32.mrf.mxu2 }
 0x203   :  { %v2649_v7 = vpop.f32.mrf.mxu0 }
 0x204   :  { %v2650_v47 = vadd.f32 %v2649_v7, %v2637_v60 }
 0x206   :  { %v2758_v9 = vmax.f32 %v2650_v47, 0.0 }
 0x208   :  { %v2762_v10 = vpack.c.bf16 %v2758_v9, %v2758_v9 }
 0x20a   :  { %2981 = vmatmul.bf16.vlgmr.msrb.gmra.mxu1 %v2762_v10 }
 0x20b   :  { %v2651_v13 = vpop.f32.mrf.mxu0 }
 0x213   :  { %v2701_v19 = vpop.f32.mrf.mxu0 }
 0x214   :  { %v2702_v61 = vadd.f32 %v2701_v19, %v2689_v16 }
 0x216   :  { %v2759_v14 = vmax.f32 %v2702_v61, 0.0 }
 0x217   :  { %v2740_v0 = vpop.f32.mrf.mxu2 }
 0x218   :  { %v2763_v20 = vpack.c.bf16 %v2759_v14, %v2759_v14  ;;  %v2741_v24 = vadd.f32 %v2740_v0, %v5201_v45 }
 0x21a   :  { %2994 = vmatmul.bf16.vlgmr.msrb.gmra.mxu2 %v2763_v20 }
 0x21b   :  { %v2703_v21 = vpop.f32.mrf.mxu0 }
 0x21f   :  { %v2742_v23 = vpop.f32.mrf.mxu2 }
 0x233   :  { %v2753_v25 = vpop.f32.mrf.mxu0 }
 0x234   :  { %v2754_v26 = vadd.f32 %v2753_v25, %v2741_v24 }
 0x236   :  { %v2760_v36 = vmax.f32 %v2754_v26, 0.0 }
 0x238   :  { %v2764_v28 = vpack.c.bf16 %v2760_v36, %v2760_v36 }
 0x23a   :  { %3007 = vmatmul.bf16.vlgmr.msrb.gmra.mxu0 %v2764_v28 }
 0x23b   :  { %v2755_v29 = vpop.f32.mrf.mxu0 }
 0x27d   :  { %v2969_v54 = vpop.f32.mrf.mxu3 }
 0x27e   :  { %v2970_v35 = vadd.f32 %v4829_v34, %v2969_v54 }
 0x285   :  { %v2971_v22 = vpop.f32.mrf.mxu3 }
 0x287   :  { %v2982_v40 = vpop.f32.mrf.mxu1 }
 0x288   :  { %v2983_v38 = vadd.f32 %v2982_v40, %v2970_v35 }
 0x28f   :  { %v2984_v4 = vpop.f32.mrf.mxu1 }
 0x29d   :  { %v2995_v33 = vpop.f32.mrf.mxu2 }
 0x29e   :  { %v2996_v41 = vadd.f32 %v2995_v33, %v2983_v38 }
 0x2a5   :  { %v2997_v31 = vpop.f32.mrf.mxu2 }
 0x2b7   :  { %v3008_v42 = vpop.f32.mrf.mxu0 }
 0x2b8   :  { %v3009_v43 = vadd.f32 %v3008_v42, %v2996_v41 }
 0x2ba   :  { %v3012_v44 = vmax.f32 %v3009_v43, 0.0 }
 0x2bc   :  { %3013 = vst [vmem:[#allocation13] sm:$0x3] %v3012_v44 }
 0x2bd   :  { %3024 = dma.vmem_to_hbm [thread:$0]  %s3020_s9, 32, %s3022_s12, [#allocation4]  }
 0x2bf   :  { %v3010_v18 = vpop.f32.mrf.mxu0 }
 0x2c0   :  { %5006 = dma.done.wait [#allocation4], 32  }
 0x2c1   :  { %5007 = vsyncadd [#allocation4], 4294967264 }
 0x2c2   :  { %3029 = vsyncpa [#allocation3], 1 }
 0x2c3   :  { %3030 = vsyncpa [#allocation6], 1 }
 0x2c4   :  { %3031 = vsyncpa [#allocation9], 1 }
 0x2c5   :  { %3032 = vsyncpa [#allocation12], 1 }
 0x2c6   :  { %3033 = vsyncpa [#allocation4], 1 }

</bundles_post_ra>
